<compile_context>
chip_gen: v7x
topology: tpu7x:2x2x1
jax: 0.10.0
libtpu: 0.0.40
codegen_flags: <defaults>
</compile_context>

<pallas_src>
import math

import jax
import jax.numpy as jnp
from jax.experimental import pallas as pl
from jax.experimental.pallas import tpu as pltpu

D_MODEL = 32
D_FF = 64
HEADS = 4
D_HEAD = D_MODEL // HEADS
LN_EPS = 1e-5       # nn.LayerNorm default
NEG_INF = -1e9      # additive mask bias (finite, unlike PyTorch's -inf; differs
                    # only for fully-masked rows, which would be NaN in PyTorch)

# ---- packed weight-slab column offsets (32 rows, 320 cols) ----
_W_QKV1 = 0     # 96 cols : fused Wq|Wk|Wv of self-attn (scale folded into Wq)
_W_O1   = 96    # 32 cols : self-attn output proj
_W_Q2   = 128   # 32 cols : cross-attn Wq (scale folded)
_W_KV2  = 160   # 64 cols : fused Wk|Wv of cross-attn
_W_O2   = 224   # 32 cols : cross-attn output proj
_W_FF1  = 256   # 64 cols : FFN first linear
_W_COLS = 320

# ---- packed bias/LN row offsets (1 x 544) ----
_V_LN1G, _V_LN1B = 0, 32
_V_BQKV1 = 64            # 96
_V_BO1   = 160           # 32
_V_LN2G, _V_LN2B = 192, 224
_V_BQ2   = 256           # 32
_V_BKV2  = 288           # 64
_V_BO2   = 352           # 32
_V_LN3G, _V_LN3B = 384, 416
_V_FFB1  = 448           # 64
_V_FFB2  = 512           # 32
_V_COLS  = 544


# ---------------------------- fused layer kernel -----------------------------
def _decoder_layer_kernel(x_ref, enc_ref, mask_ref, w_ref, ffw2_ref, vec_ref, o_ref):
    S = mask_ref.shape[-1]
    BS = x_ref.shape[0]
    B = BS // S
    Se = enc_ref.shape[0] // B

    x = x_ref[...].astype(jnp.float32)        # (B*S, D)
    enc = enc_ref[...].astype(jnp.float32)    # (B*Se, D)

    def vrow(off, n):
        return vec_ref[:, off:off + n]        # (1, n) static view -> broadcast

    def layer_norm(v, g, b):
        mu = jnp.mean(v, axis=-1, keepdims=True)
        vc = v - mu
        var = jnp.mean(vc * vc, axis=-1, keepdims=True)
        return vc * jax.lax.rsqrt(var + LN_EPS) * g + b

    # Additive attention bias from the boolean mask (True / nonzero = attend).
    if mask_ref.ndim == 2:                     # shared mask (e.g. causal)
        shared_bias = jnp.where(mask_ref[...] != 0, 0.0, NEG_INF)
        bias_fn = lambda bidx: shared_bias
    else:                                      # per-batch (B, S, S) mask
        bias_fn = lambda bidx: jnp.where(mask_ref[bidx] != 0, 0.0, NEG_INF)

    def attend(q, k, v, wo, bo, Sq, Sk, use_mask):
        # q: (B*Sq, D), k/v: (B*Sk, D).  Batch & heads are tiny -> unrolled
        # Python loops; contexts are lane-concatenated per batch and
        # row-concatenated across batches so the output projection is ONE
        # (B*Sq, D) x (D, D) matmul (1 MXU push instead of B*H).
        ctx_rows = []
        for bidx in range(B):
            qb = q[bidx * Sq:(bidx + 1) * Sq]
            kb = k[bidx * Sk:(bidx + 1) * Sk]
            vb = v[bidx * Sk:(bidx + 1) * Sk]
            bias = bias_fn(bidx) if use_mask else None
            heads = []
            for h in range(HEADS):
                sl = slice(h * D_HEAD, (h + 1) * D_HEAD)
                # scores: contract head-dim of q and k (q already pre-scaled)
                s = jax.lax.dot_general(
                    qb[:, sl], kb[:, sl], (((1,), (1,)), ((), ())),
                    preferred_element_type=jnp.float32)
                if bias is not None:
                    s = s + bias
                m = jnp.max(s, axis=-1, keepdims=True)
                p = jnp.exp(s - m)
                p = p / jnp.sum(p, axis=-1, keepdims=True)   # exact softmax
                heads.append(jnp.dot(p, vb[:, sl],
                                     preferred_element_type=jnp.float32))
            ctx_rows.append(jnp.concatenate(heads, axis=-1))   # (Sq, D)
        ctx = jnp.concatenate(ctx_rows, axis=0)                # (B*Sq, D)
        return jnp.dot(ctx, wo, preferred_element_type=jnp.float32) + bo

    # ---- self-attention sublayer (pre-norm, masked, fused QKV) ----
    z = layer_norm(x, vrow(_V_LN1G, D_MODEL), vrow(_V_LN1B, D_MODEL))
    qkv = jnp.dot(z, w_ref[:, _W_QKV1:_W_QKV1 + 3 * D_MODEL],
                  preferred_element_type=jnp.float32) + vrow(_V_BQKV1, 3 * D_MODEL)
    q = qkv[:, :D_MODEL]
    k = qkv[:, D_MODEL:2 * D_MODEL]
    v = qkv[:, 2 * D_MODEL:]
    x = x + attend(q, k, v, w_ref[:, _W_O1:_W_O1 + D_MODEL],
                   vrow(_V_BO1, D_MODEL), S, S, True)

    # ---- cross-attention sublayer (no mask, matching the reference forward) ----
    z = layer_norm(x, vrow(_V_LN2G, D_MODEL), vrow(_V_LN2B, D_MODEL))
    q = jnp.dot(z, w_ref[:, _W_Q2:_W_Q2 + D_MODEL],
                preferred_element_type=jnp.float32) + vrow(_V_BQ2, D_MODEL)
    kv = jnp.dot(enc, w_ref[:, _W_KV2:_W_KV2 + 2 * D_MODEL],
                 preferred_element_type=jnp.float32) + vrow(_V_BKV2, 2 * D_MODEL)
    k = kv[:, :D_MODEL]
    v = kv[:, D_MODEL:]
    x = x + attend(q, k, v, w_ref[:, _W_O2:_W_O2 + D_MODEL],
                   vrow(_V_BO2, D_MODEL), S, Se, False)

    # ---- feed-forward sublayer (ELU, non-gated) ----
    z = layer_norm(x, vrow(_V_LN3G, D_MODEL), vrow(_V_LN3B, D_MODEL))
    h = jnp.dot(z, w_ref[:, _W_FF1:_W_FF1 + D_FF],
                preferred_element_type=jnp.float32) + vrow(_V_FFB1, D_FF)
    h = jnp.where(h > 0.0, h, jnp.exp(jnp.minimum(h, 0.0)) - 1.0)   # ELU(alpha=1)
    y = jnp.dot(h, ffw2_ref[...],
                preferred_element_type=jnp.float32) + vrow(_V_FFB2, D_MODEL)
    x = x + y

    o_ref[...] = x.astype(o_ref.dtype)


# ------------------------------ host wrappers --------------------------------
def pack_params(params):
    """One-time host-side packing: fuse QKV / KV, fold the 1/sqrt(d_head)
    attention scale into the Q weights & biases, and concatenate everything
    into 3 arrays (weight slab, ffw2, bias/LN row)."""
    a1, a2 = params["attn1"], params["attn2"]
    scale = 1.0 / math.sqrt(D_HEAD)
    w_slab = jnp.concatenate(
        [a1["wq"] * scale, a1["wk"], a1["wv"],     # 0:96   fused QKV (self)
         a1["wo"],                                 # 96:128 out-proj (self)
         a2["wq"] * scale,                         # 128:160 Wq (cross)
         a2["wk"], a2["wv"],                       # 160:224 fused KV (cross)
         a2["wo"],                                 # 224:256 out-proj (cross)
         params["ff_w1"]],                         # 256:320 FFN linear-1
        axis=1)
    assert w_slab.shape == (D_MODEL, _W_COLS)
    ffw2 = params["ff_w2"]                         # (64, 32)
    vec = jnp.concatenate(
        [params["ln1_g"], params["ln1_b"],
         a1["bq"] * scale, a1["bk"], a1["bv"],
         a1["bo"],
         params["ln2_g"], params["ln2_b"],
         a2["bq"] * scale,
         a2["bk"], a2["bv"],
         a2["bo"],
         params["ln3_g"], params["ln3_b"],
         params["ff_b1"], params["ff_b2"]]).reshape(1, -1)
    assert vec.shape == (1, _V_COLS)
    return w_slab, ffw2, vec


@jax.jit
def decoder_layer(packed, x, enc, mask_out, mask_enc):
    # x: (B, S, D), enc: (B, Se, D).
    # mask_out: bool, either shared (S, S) or per-batch (B, S, S); True = attend.
    # mask_enc is accepted but unused, matching the reference forward.
    del mask_enc
    B, S, D = x.shape
    Se = enc.shape[1]
    w_slab, ffw2, vec = packed

    x2d = x.reshape(B * S, D)          # free host reshape (contiguous)
    enc2d = enc.reshape(B * Se, D)
    mask_i32 = mask_out.astype(jnp.int32)

    def full_spec(shape):
        nd = len(shape)
        return pl.BlockSpec(shape, lambda i, _nd=nd: (0,) * _nd)

    args = (x2d, enc2d, mask_i32, w_slab, ffw2, vec)
    out2d = pl.pallas_call(
        _decoder_layer_kernel,
        out_shape=jax.ShapeDtypeStruct((B * S, D), x.dtype),
        grid=(1,),                                   # single step: whole layer
        in_specs=[full_spec(a.shape) for a in args],
        out_specs=full_spec((B * S, D)),
        compiler_params=pltpu.CompilerParams(
            # Tiny workload -> keep it on one TensorCore (review: 2-TC split of
            # sub-microsecond work is a net loss on v7x).
            dimension_semantics=("arbitrary",),
        ),
    )(*args)
    return out2d.reshape(B, S, D)


# ------------------------------ parameter init --------------------------------
def _linear_init(key, fan_in, fan_out):
    kw, kb = jax.random.split(key)
    bound = 1.0 / math.sqrt(fan_in)
    w = jax.random.uniform(kw, (fan_in, fan_out), jnp.float32, -bound, bound)
    b = jax.random.uniform(kb, (fan_out,), jnp.float32, -bound, bound)
    return w, b


def init_params(key):
    keys = jax.random.split(key, 4)

    def mha_params(k):
        ks = jax.random.split(k, 4)
        wq, bq = _linear_init(ks[0], D_MODEL, D_MODEL)
        wk, bk = _linear_init(ks[1], D_MODEL, D_MODEL)
        wv, bv = _linear_init(ks[2], D_MODEL, D_MODEL)
        wo, bo = _linear_init(ks[3], D_MODEL, D_MODEL)
        return dict(wq=wq, bq=bq, wk=wk, bk=bk, wv=wv, bv=bv, wo=wo, bo=bo)

    ff_w1, ff_b1 = _linear_init(keys[2], D_MODEL, D_FF)
    ff_w2, ff_b2 = _linear_init(keys[3], D_FF, D_MODEL)

    return dict(
        attn1=mha_params(keys[0]),
        attn2=mha_params(keys[1]),
        ff_w1=ff_w1, ff_b1=ff_b1, ff_w2=ff_w2, ff_b2=ff_b2,
        ln1_g=jnp.ones((D_MODEL,), jnp.float32), ln1_b=jnp.zeros((D_MODEL,), jnp.float32),
        ln2_g=jnp.ones((D_MODEL,), jnp.float32), ln2_b=jnp.zeros((D_MODEL,), jnp.float32),
        ln3_g=jnp.ones((D_MODEL,), jnp.float32), ln3_b=jnp.zeros((D_MODEL,), jnp.float32),
    )


if __name__ == "__main__":
    B, S, SE = 2, 8, 8
    root = jax.random.PRNGKey(0)
    kp, kx, ke = jax.random.split(root, 3)

    params = init_params(kp)
    packed = pack_params(params)
    x = jax.random.normal(kx, (B, S, D_MODEL), jnp.float32)
    enc = jax.random.normal(ke, (B, SE, D_MODEL), jnp.float32)
    # Shared causal self-attention mask (True = may attend); no (B,S,S) broadcast.
    mask_out = jnp.tril(jnp.ones((S, S), bool))
    # Encoder mask (unused by the reference forward, kept for signature parity).
    mask_enc = jnp.ones((B, S, SE), bool)

    out = decoder_layer(packed, x, enc, mask_out, mask_enc)
    out = jax.block_until_ready(out)
    assert out.shape == (B, S, D_MODEL) and out.dtype == jnp.float32
    assert bool(jnp.all(jnp.isfinite(out)))
    print("KERNEL_OK")
</pallas_src>

<mosaic_0001>
module attributes {stable_mosaic.version = 11 : i64} {
  func.func @_decoder_layer_kernel(%arg0: i32, %arg1: memref<16x32xf32, #tpu.memory_space<vmem>>, %arg2: memref<16x32xf32, #tpu.memory_space<vmem>>, %arg3: memref<8x8xi32, #tpu.memory_space<vmem>>, %arg4: memref<32x320xf32, #tpu.memory_space<vmem>>, %arg5: memref<64x32xf32, #tpu.memory_space<vmem>>, %arg6: memref<1x544xf32, #tpu.memory_space<vmem>>, %arg7: memref<16x32xf32, #tpu.memory_space<vmem>>) attributes {dimension_semantics = [#tpu.dimension_semantics<arbitrary>], iteration_bounds = array<i64: 1>, scalar_prefetch = 0 : i64, scratch_operands = 0 : i64, tpu.core_type = #tpu.core_type<tc>, window_params = [{pipeline_mode = #tpu.pipeline_mode<synchronous>, transform_indices = @transform_0, window_bounds = array<i64: 16, 32>}, {pipeline_mode = #tpu.pipeline_mode<synchronous>, transform_indices = @transform_1, window_bounds = array<i64: 16, 32>}, {pipeline_mode = #tpu.pipeline_mode<synchronous>, transform_indices = @transform_2, window_bounds = array<i64: 8, 8>}, {pipeline_mode = #tpu.pipeline_mode<synchronous>, transform_indices = @transform_3, window_bounds = array<i64: 32, 320>}, {pipeline_mode = #tpu.pipeline_mode<synchronous>, transform_indices = @transform_4, window_bounds = array<i64: 64, 32>}, {pipeline_mode = #tpu.pipeline_mode<synchronous>, transform_indices = @transform_5, window_bounds = array<i64: 1, 544>}, {pipeline_mode = #tpu.pipeline_mode<synchronous>, transform_indices = @transform_6, window_bounds = array<i64: 16, 32>}]} {
    %c0 = arith.constant 0 : index
    %c0_0 = arith.constant 0 : index
    %0 = vector.load %arg1[%c0, %c0_0] : memref<16x32xf32, #tpu.memory_space<vmem>>, vector<16x32xf32>
    %c0_1 = arith.constant 0 : index
    %c0_2 = arith.constant 0 : index
    %1 = vector.load %arg2[%c0_1, %c0_2] : memref<16x32xf32, #tpu.memory_space<vmem>>, vector<16x32xf32>
    %c0_3 = arith.constant 0 : index
    %c0_4 = arith.constant 0 : index
    %2 = vector.load %arg3[%c0_3, %c0_4] : memref<8x8xi32, #tpu.memory_space<vmem>>, vector<8x8xi32>
    %c0_i32 = arith.constant 0 : i32
    %3 = vector.broadcast %c0_i32 : i32 to vector<8x8xi32>
    %4 = arith.cmpi ne, %2, %3 : vector<8x8xi32>
    %cst = arith.constant 0.000000e+00 : f32
    %cst_5 = arith.constant -1.000000e+09 : f32
    %5 = vector.broadcast %cst : f32 to vector<8x8xf32>
    %6 = vector.broadcast %cst_5 : f32 to vector<8x8xf32>
    %7 = arith.select %4, %5, %6 : vector<8x8xi1>, vector<8x8xf32>
    %c0_6 = arith.constant 0 : index
    %c0_7 = arith.constant 0 : index
    %8 = vector.load %arg6[%c0_6, %c0_7] : memref<1x544xf32, #tpu.memory_space<vmem>>, vector<1x32xf32>
    %c0_8 = arith.constant 0 : index
    %c32 = arith.constant 32 : index
    %9 = vector.load %arg6[%c0_8, %c32] : memref<1x544xf32, #tpu.memory_space<vmem>>, vector<1x32xf32>
    %cst_9 = arith.constant dense<0.000000e+00> : vector<16xf32>
    %10 = vector.multi_reduction <add>, %0, %cst_9 [1] : vector<16x32xf32> to vector<16xf32>
    %11 = vector.shape_cast %10 : vector<16xf32> to vector<16x1xf32>
    %cst_10 = arith.constant 3.200000e+01 : f32
    %12 = vector.broadcast %cst_10 : f32 to vector<16x1xf32>
    %13 = arith.divf %11, %12 : vector<16x1xf32>
    %14 = vector.broadcast %13 : vector<16x1xf32> to vector<16x32xf32>
    %15 = arith.subf %0, %14 : vector<16x32xf32>
    %16 = arith.mulf %15, %15 : vector<16x32xf32>
    %cst_11 = arith.constant dense<0.000000e+00> : vector<16xf32>
    %17 = vector.multi_reduction <add>, %16, %cst_11 [1] : vector<16x32xf32> to vector<16xf32>
    %18 = vector.shape_cast %17 : vector<16xf32> to vector<16x1xf32>
    %cst_12 = arith.constant 3.200000e+01 : f32
    %19 = vector.broadcast %cst_12 : f32 to vector<16x1xf32>
    %20 = arith.divf %18, %19 : vector<16x1xf32>
    %cst_13 = arith.constant 9.99999974E-6 : f32
    %21 = vector.broadcast %cst_13 : f32 to vector<16x1xf32>
    %22 = arith.addf %20, %21 : vector<16x1xf32>
    %23 = math.rsqrt %22 : vector<16x1xf32>
    %24 = vector.broadcast %23 : vector<16x1xf32> to vector<16x32xf32>
    %25 = arith.mulf %15, %24 : vector<16x32xf32>
    %26 = vector.broadcast %8 : vector<1x32xf32> to vector<16x32xf32>
    %27 = arith.mulf %25, %26 : vector<16x32xf32>
    %28 = vector.broadcast %9 : vector<1x32xf32> to vector<16x32xf32>
    %29 = arith.addf %27, %28 : vector<16x32xf32>
    %c0_14 = arith.constant 0 : index
    %c0_15 = arith.constant 0 : index
    %30 = vector.load %arg4[%c0_14, %c0_15] : memref<32x320xf32, #tpu.memory_space<vmem>>, vector<32x96xf32>
    %cst_16 = arith.constant dense<0.000000e+00> : vector<16x96xf32>
    %31 = tpu.matmul %29, %30, %cst_16 {dimension_numbers = #tpu.dot_dimension_numbers<[1], [0], [0], [1], [0, 0, 1, 1], [], []>} : vector<16x32xf32>, vector<32x96xf32>, vector<16x96xf32> -> vector<16x96xf32>
    %c0_17 = arith.constant 0 : index
    %c64 = arith.constant 64 : index
    %32 = vector.load %arg6[%c0_17, %c64] : memref<1x544xf32, #tpu.memory_space<vmem>>, vector<1x96xf32>
    %33 = vector.broadcast %32 : vector<1x96xf32> to vector<16x96xf32>
    %34 = arith.addf %31, %33 : vector<16x96xf32>
    %35 = vector.extract_strided_slice %34 {offsets = [0, 0], sizes = [16, 32], strides = [1, 1]} : vector<16x96xf32> to vector<16x32xf32>
    %36 = vector.extract_strided_slice %34 {offsets = [0, 32], sizes = [16, 32], strides = [1, 1]} : vector<16x96xf32> to vector<16x32xf32>
    %37 = vector.extract_strided_slice %34 {offsets = [0, 64], sizes = [16, 32], strides = [1, 1]} : vector<16x96xf32> to vector<16x32xf32>
    %c0_18 = arith.constant 0 : index
    %c96 = arith.constant 96 : index
    %38 = vector.load %arg4[%c0_18, %c96] : memref<32x320xf32, #tpu.memory_space<vmem>>, vector<32x32xf32>
    %c0_19 = arith.constant 0 : index
    %c160 = arith.constant 160 : index
    %39 = vector.load %arg6[%c0_19, %c160] : memref<1x544xf32, #tpu.memory_space<vmem>>, vector<1x32xf32>
    %40 = vector.extract_strided_slice %35 {offsets = [0, 0], sizes = [8, 32], strides = [1, 1]} : vector<16x32xf32> to vector<8x32xf32>
    %41 = vector.extract_strided_slice %36 {offsets = [0, 0], sizes = [8, 32], strides = [1, 1]} : vector<16x32xf32> to vector<8x32xf32>
    %42 = vector.extract_strided_slice %37 {offsets = [0, 0], sizes = [8, 32], strides = [1, 1]} : vector<16x32xf32> to vector<8x32xf32>
    %43 = vector.extract_strided_slice %40 {offsets = [0, 0], sizes = [8, 8], strides = [1, 1]} : vector<8x32xf32> to vector<8x8xf32>
    %44 = vector.extract_strided_slice %41 {offsets = [0, 0], sizes = [8, 8], strides = [1, 1]} : vector<8x32xf32> to vector<8x8xf32>
    %cst_20 = arith.constant dense<0.000000e+00> : vector<8x8xf32>
    %45 = tpu.matmul %43, %44, %cst_20 {dimension_numbers = #tpu.dot_dimension_numbers<[1], [1], [0], [0], [0, 0, 1, 0], [], []>} : vector<8x8xf32>, vector<8x8xf32>, vector<8x8xf32> -> vector<8x8xf32>
    %46 = arith.addf %45, %7 : vector<8x8xf32>
    %cst_21 = arith.constant dense<0xFF800000> : vector<8xf32>
    %47 = vector.multi_reduction <maximumf>, %46, %cst_21 [1] : vector<8x8xf32> to vector<8xf32>
    %48 = vector.shape_cast %47 : vector<8xf32> to vector<8x1xf32>
    %49 = vector.broadcast %48 : vector<8x1xf32> to vector<8x8xf32>
    %50 = arith.subf %46, %49 : vector<8x8xf32>
    %51 = math.exp %50 : vector<8x8xf32>
    %cst_22 = arith.constant dense<0.000000e+00> : vector<8xf32>
    %52 = vector.multi_reduction <add>, %51, %cst_22 [1] : vector<8x8xf32> to vector<8xf32>
    %53 = vector.shape_cast %52 : vector<8xf32> to vector<8x1xf32>
    %54 = vector.broadcast %53 : vector<8x1xf32> to vector<8x8xf32>
    %55 = arith.divf %51, %54 : vector<8x8xf32>
    %56 = vector.extract_strided_slice %42 {offsets = [0, 0], sizes = [8, 8], strides = [1, 1]} : vector<8x32xf32> to vector<8x8xf32>
    %cst_23 = arith.constant dense<0.000000e+00> : vector<8x8xf32>
    %57 = tpu.matmul %55, %56, %cst_23 {dimension_numbers = #tpu.dot_dimension_numbers<[1], [0], [0], [1], [0, 0, 1, 1], [], []>} : vector<8x8xf32>, vector<8x8xf32>, vector<8x8xf32> -> vector<8x8xf32>
    %58 = vector.extract_strided_slice %40 {offsets = [0, 8], sizes = [8, 8], strides = [1, 1]} : vector<8x32xf32> to vector<8x8xf32>
    %59 = vector.extract_strided_slice %41 {offsets = [0, 8], sizes = [8, 8], strides = [1, 1]} : vector<8x32xf32> to vector<8x8xf32>
    %cst_24 = arith.constant dense<0.000000e+00> : vector<8x8xf32>
    %60 = tpu.matmul %58, %59, %cst_24 {dimension_numbers = #tpu.dot_dimension_numbers<[1], [1], [0], [0], [0, 0, 1, 0], [], []>} : vector<8x8xf32>, vector<8x8xf32>, vector<8x8xf32> -> vector<8x8xf32>
    %61 = arith.addf %60, %7 : vector<8x8xf32>
    %cst_25 = arith.constant dense<0xFF800000> : vector<8xf32>
    %62 = vector.multi_reduction <maximumf>, %61, %cst_25 [1] : vector<8x8xf32> to vector<8xf32>
    %63 = vector.shape_cast %62 : vector<8xf32> to vector<8x1xf32>
    %64 = vector.broadcast %63 : vector<8x1xf32> to vector<8x8xf32>
    %65 = arith.subf %61, %64 : vector<8x8xf32>
    %66 = math.exp %65 : vector<8x8xf32>
    %cst_26 = arith.constant dense<0.000000e+00> : vector<8xf32>
    %67 = vector.multi_reduction <add>, %66, %cst_26 [1] : vector<8x8xf32> to vector<8xf32>
    %68 = vector.shape_cast %67 : vector<8xf32> to vector<8x1xf32>
    %69 = vector.broadcast %68 : vector<8x1xf32> to vector<8x8xf32>
    %70 = arith.divf %66, %69 : vector<8x8xf32>
    %71 = vector.extract_strided_slice %42 {offsets = [0, 8], sizes = [8, 8], strides = [1, 1]} : vector<8x32xf32> to vector<8x8xf32>
    %cst_27 = arith.constant dense<0.000000e+00> : vector<8x8xf32>
    %72 = tpu.matmul %70, %71, %cst_27 {dimension_numbers = #tpu.dot_dimension_numbers<[1], [0], [0], [1], [0, 0, 1, 1], [], []>} : vector<8x8xf32>, vector<8x8xf32>, vector<8x8xf32> -> vector<8x8xf32>
    %73 = vector.extract_strided_slice %40 {offsets = [0, 16], sizes = [8, 8], strides = [1, 1]} : vector<8x32xf32> to vector<8x8xf32>
    %74 = vector.extract_strided_slice %41 {offsets = [0, 16], sizes = [8, 8], strides = [1, 1]} : vector<8x32xf32> to vector<8x8xf32>
    %cst_28 = arith.constant dense<0.000000e+00> : vector<8x8xf32>
    %75 = tpu.matmul %73, %74, %cst_28 {dimension_numbers = #tpu.dot_dimension_numbers<[1], [1], [0], [0], [0, 0, 1, 0], [], []>} : vector<8x8xf32>, vector<8x8xf32>, vector<8x8xf32> -> vector<8x8xf32>
    %76 = arith.addf %75, %7 : vector<8x8xf32>
    %cst_29 = arith.constant dense<0xFF800000> : vector<8xf32>
    %77 = vector.multi_reduction <maximumf>, %76, %cst_29 [1] : vector<8x8xf32> to vector<8xf32>
    %78 = vector.shape_cast %77 : vector<8xf32> to vector<8x1xf32>
    %79 = vector.broadcast %78 : vector<8x1xf32> to vector<8x8xf32>
    %80 = arith.subf %76, %79 : vector<8x8xf32>
    %81 = math.exp %80 : vector<8x8xf32>
    %cst_30 = arith.constant dense<0.000000e+00> : vector<8xf32>
    %82 = vector.multi_reduction <add>, %81, %cst_30 [1] : vector<8x8xf32> to vector<8xf32>
    %83 = vector.shape_cast %82 : vector<8xf32> to vector<8x1xf32>
    %84 = vector.broadcast %83 : vector<8x1xf32> to vector<8x8xf32>
    %85 = arith.divf %81, %84 : vector<8x8xf32>
    %86 = vector.extract_strided_slice %42 {offsets = [0, 16], sizes = [8, 8], strides = [1, 1]} : vector<8x32xf32> to vector<8x8xf32>
    %cst_31 = arith.constant dense<0.000000e+00> : vector<8x8xf32>
    %87 = tpu.matmul %85, %86, %cst_31 {dimension_numbers = #tpu.dot_dimension_numbers<[1], [0], [0], [1], [0, 0, 1, 1], [], []>} : vector<8x8xf32>, vector<8x8xf32>, vector<8x8xf32> -> vector<8x8xf32>
    %88 = vector.extract_strided_slice %40 {offsets = [0, 24], sizes = [8, 8], strides = [1, 1]} : vector<8x32xf32> to vector<8x8xf32>
    %89 = vector.extract_strided_slice %41 {offsets = [0, 24], sizes = [8, 8], strides = [1, 1]} : vector<8x32xf32> to vector<8x8xf32>
    %cst_32 = arith.constant dense<0.000000e+00> : vector<8x8xf32>
    %90 = tpu.matmul %88, %89, %cst_32 {dimension_numbers = #tpu.dot_dimension_numbers<[1], [1], [0], [0], [0, 0, 1, 0], [], []>} : vector<8x8xf32>, vector<8x8xf32>, vector<8x8xf32> -> vector<8x8xf32>
    %91 = arith.addf %90, %7 : vector<8x8xf32>
    %cst_33 = arith.constant dense<0xFF800000> : vector<8xf32>
    %92 = vector.multi_reduction <maximumf>, %91, %cst_33 [1] : vector<8x8xf32> to vector<8xf32>
    %93 = vector.shape_cast %92 : vector<8xf32> to vector<8x1xf32>
    %94 = vector.broadcast %93 : vector<8x1xf32> to vector<8x8xf32>
    %95 = arith.subf %91, %94 : vector<8x8xf32>
    %96 = math.exp %95 : vector<8x8xf32>
    %cst_34 = arith.constant dense<0.000000e+00> : vector<8xf32>
    %97 = vector.multi_reduction <add>, %96, %cst_34 [1] : vector<8x8xf32> to vector<8xf32>
    %98 = vector.shape_cast %97 : vector<8xf32> to vector<8x1xf32>
    %99 = vector.broadcast %98 : vector<8x1xf32> to vector<8x8xf32>
    %100 = arith.divf %96, %99 : vector<8x8xf32>
    %101 = vector.extract_strided_slice %42 {offsets = [0, 24], sizes = [8, 8], strides = [1, 1]} : vector<8x32xf32> to vector<8x8xf32>
    %cst_35 = arith.constant dense<0.000000e+00> : vector<8x8xf32>
    %102 = tpu.matmul %100, %101, %cst_35 {dimension_numbers = #tpu.dot_dimension_numbers<[1], [0], [0], [1], [0, 0, 1, 1], [], []>} : vector<8x8xf32>, vector<8x8xf32>, vector<8x8xf32> -> vector<8x8xf32>
    %103 = tpu.concatenate %57, %72, %87, %102 in 1 : vector<8x8xf32>, vector<8x8xf32>, vector<8x8xf32>, vector<8x8xf32> -> vector<8x32xf32>
    %104 = vector.extract_strided_slice %35 {offsets = [8, 0], sizes = [8, 32], strides = [1, 1]} : vector<16x32xf32> to vector<8x32xf32>
    %105 = vector.extract_strided_slice %36 {offsets = [8, 0], sizes = [8, 32], strides = [1, 1]} : vector<16x32xf32> to vector<8x32xf32>
    %106 = vector.extract_strided_slice %37 {offsets = [8, 0], sizes = [8, 32], strides = [1, 1]} : vector<16x32xf32> to vector<8x32xf32>
    %107 = vector.extract_strided_slice %104 {offsets = [0, 0], sizes = [8, 8], strides = [1, 1]} : vector<8x32xf32> to vector<8x8xf32>
    %108 = vector.extract_strided_slice %105 {offsets = [0, 0], sizes = [8, 8], strides = [1, 1]} : vector<8x32xf32> to vector<8x8xf32>
    %cst_36 = arith.constant dense<0.000000e+00> : vector<8x8xf32>
    %109 = tpu.matmul %107, %108, %cst_36 {dimension_numbers = #tpu.dot_dimension_numbers<[1], [1], [0], [0], [0, 0, 1, 0], [], []>} : vector<8x8xf32>, vector<8x8xf32>, vector<8x8xf32> -> vector<8x8xf32>
    %110 = arith.addf %109, %7 : vector<8x8xf32>
    %cst_37 = arith.constant dense<0xFF800000> : vector<8xf32>
    %111 = vector.multi_reduction <maximumf>, %110, %cst_37 [1] : vector<8x8xf32> to vector<8xf32>
    %112 = vector.shape_cast %111 : vector<8xf32> to vector<8x1xf32>
    %113 = vector.broadcast %112 : vector<8x1xf32> to vector<8x8xf32>
    %114 = arith.subf %110, %113 : vector<8x8xf32>
    %115 = math.exp %114 : vector<8x8xf32>
    %cst_38 = arith.constant dense<0.000000e+00> : vector<8xf32>
    %116 = vector.multi_reduction <add>, %115, %cst_38 [1] : vector<8x8xf32> to vector<8xf32>
    %117 = vector.shape_cast %116 : vector<8xf32> to vector<8x1xf32>
    %118 = vector.broadcast %117 : vector<8x1xf32> to vector<8x8xf32>
    %119 = arith.divf %115, %118 : vector<8x8xf32>
    %120 = vector.extract_strided_slice %106 {offsets = [0, 0], sizes = [8, 8], strides = [1, 1]} : vector<8x32xf32> to vector<8x8xf32>
    %cst_39 = arith.constant dense<0.000000e+00> : vector<8x8xf32>
    %121 = tpu.matmul %119, %120, %cst_39 {dimension_numbers = #tpu.dot_dimension_numbers<[1], [0], [0], [1], [0, 0, 1, 1], [], []>} : vector<8x8xf32>, vector<8x8xf32>, vector<8x8xf32> -> vector<8x8xf32>
    %122 = vector.extract_strided_slice %104 {offsets = [0, 8], sizes = [8, 8], strides = [1, 1]} : vector<8x32xf32> to vector<8x8xf32>
    %123 = vector.extract_strided_slice %105 {offsets = [0, 8], sizes = [8, 8], strides = [1, 1]} : vector<8x32xf32> to vector<8x8xf32>
    %cst_40 = arith.constant dense<0.000000e+00> : vector<8x8xf32>
    %124 = tpu.matmul %122, %123, %cst_40 {dimension_numbers = #tpu.dot_dimension_numbers<[1], [1], [0], [0], [0, 0, 1, 0], [], []>} : vector<8x8xf32>, vector<8x8xf32>, vector<8x8xf32> -> vector<8x8xf32>
    %125 = arith.addf %124, %7 : vector<8x8xf32>
    %cst_41 = arith.constant dense<0xFF800000> : vector<8xf32>
    %126 = vector.multi_reduction <maximumf>, %125, %cst_41 [1] : vector<8x8xf32> to vector<8xf32>
    %127 = vector.shape_cast %126 : vector<8xf32> to vector<8x1xf32>
    %128 = vector.broadcast %127 : vector<8x1xf32> to vector<8x8xf32>
    %129 = arith.subf %125, %128 : vector<8x8xf32>
    %130 = math.exp %129 : vector<8x8xf32>
    %cst_42 = arith.constant dense<0.000000e+00> : vector<8xf32>
    %131 = vector.multi_reduction <add>, %130, %cst_42 [1] : vector<8x8xf32> to vector<8xf32>
    %132 = vector.shape_cast %131 : vector<8xf32> to vector<8x1xf32>
    %133 = vector.broadcast %132 : vector<8x1xf32> to vector<8x8xf32>
    %134 = arith.divf %130, %133 : vector<8x8xf32>
    %135 = vector.extract_strided_slice %106 {offsets = [0, 8], sizes = [8, 8], strides = [1, 1]} : vector<8x32xf32> to vector<8x8xf32>
    %cst_43 = arith.constant dense<0.000000e+00> : vector<8x8xf32>
    %136 = tpu.matmul %134, %135, %cst_43 {dimension_numbers = #tpu.dot_dimension_numbers<[1], [0], [0], [1], [0, 0, 1, 1], [], []>} : vector<8x8xf32>, vector<8x8xf32>, vector<8x8xf32> -> vector<8x8xf32>
    %137 = vector.extract_strided_slice %104 {offsets = [0, 16], sizes = [8, 8], strides = [1, 1]} : vector<8x32xf32> to vector<8x8xf32>
    %138 = vector.extract_strided_slice %105 {offsets = [0, 16], sizes = [8, 8], strides = [1, 1]} : vector<8x32xf32> to vector<8x8xf32>
    %cst_44 = arith.constant dense<0.000000e+00> : vector<8x8xf32>
    %139 = tpu.matmul %137, %138, %cst_44 {dimension_numbers = #tpu.dot_dimension_numbers<[1], [1], [0], [0], [0, 0, 1, 0], [], []>} : vector<8x8xf32>, vector<8x8xf32>, vector<8x8xf32> -> vector<8x8xf32>
    %140 = arith.addf %139, %7 : vector<8x8xf32>
    %cst_45 = arith.constant dense<0xFF800000> : vector<8xf32>
    %141 = vector.multi_reduction <maximumf>, %140, %cst_45 [1] : vector<8x8xf32> to vector<8xf32>
    %142 = vector.shape_cast %141 : vector<8xf32> to vector<8x1xf32>
    %143 = vector.broadcast %142 : vector<8x1xf32> to vector<8x8xf32>
    %144 = arith.subf %140, %143 : vector<8x8xf32>
    %145 = math.exp %144 : vector<8x8xf32>
    %cst_46 = arith.constant dense<0.000000e+00> : vector<8xf32>
    %146 = vector.multi_reduction <add>, %145, %cst_46 [1] : vector<8x8xf32> to vector<8xf32>
    %147 = vector.shape_cast %146 : vector<8xf32> to vector<8x1xf32>
    %148 = vector.broadcast %147 : vector<8x1xf32> to vector<8x8xf32>
    %149 = arith.divf %145, %148 : vector<8x8xf32>
    %150 = vector.extract_strided_slice %106 {offsets = [0, 16], sizes = [8, 8], strides = [1, 1]} : vector<8x32xf32> to vector<8x8xf32>
    %cst_47 = arith.constant dense<0.000000e+00> : vector<8x8xf32>
    %151 = tpu.matmul %149, %150, %cst_47 {dimension_numbers = #tpu.dot_dimension_numbers<[1], [0], [0], [1], [0, 0, 1, 1], [], []>} : vector<8x8xf32>, vector<8x8xf32>, vector<8x8xf32> -> vector<8x8xf32>
    %152 = vector.extract_strided_slice %104 {offsets = [0, 24], sizes = [8, 8], strides = [1, 1]} : vector<8x32xf32> to vector<8x8xf32>
    %153 = vector.extract_strided_slice %105 {offsets = [0, 24], sizes = [8, 8], strides = [1, 1]} : vector<8x32xf32> to vector<8x8xf32>
    %cst_48 = arith.constant dense<0.000000e+00> : vector<8x8xf32>
    %154 = tpu.matmul %152, %153, %cst_48 {dimension_numbers = #tpu.dot_dimension_numbers<[1], [1], [0], [0], [0, 0, 1, 0], [], []>} : vector<8x8xf32>, vector<8x8xf32>, vector<8x8xf32> -> vector<8x8xf32>
    %155 = arith.addf %154, %7 : vector<8x8xf32>
    %cst_49 = arith.constant dense<0xFF800000> : vector<8xf32>
    %156 = vector.multi_reduction <maximumf>, %155, %cst_49 [1] : vector<8x8xf32> to vector<8xf32>
    %157 = vector.shape_cast %156 : vector<8xf32> to vector<8x1xf32>
    %158 = vector.broadcast %157 : vector<8x1xf32> to vector<8x8xf32>
    %159 = arith.subf %155, %158 : vector<8x8xf32>
    %160 = math.exp %159 : vector<8x8xf32>
    %cst_50 = arith.constant dense<0.000000e+00> : vector<8xf32>
    %161 = vector.multi_reduction <add>, %160, %cst_50 [1] : vector<8x8xf32> to vector<8xf32>
    %162 = vector.shape_cast %161 : vector<8xf32> to vector<8x1xf32>
    %163 = vector.broadcast %162 : vector<8x1xf32> to vector<8x8xf32>
    %164 = arith.divf %160, %163 : vector<8x8xf32>
    %165 = vector.extract_strided_slice %106 {offsets = [0, 24], sizes = [8, 8], strides = [1, 1]} : vector<8x32xf32> to vector<8x8xf32>
    %cst_51 = arith.constant dense<0.000000e+00> : vector<8x8xf32>
    %166 = tpu.matmul %164, %165, %cst_51 {dimension_numbers = #tpu.dot_dimension_numbers<[1], [0], [0], [1], [0, 0, 1, 1], [], []>} : vector<8x8xf32>, vector<8x8xf32>, vector<8x8xf32> -> vector<8x8xf32>
    %167 = tpu.concatenate %121, %136, %151, %166 in 1 : vector<8x8xf32>, vector<8x8xf32>, vector<8x8xf32>, vector<8x8xf32> -> vector<8x32xf32>
    %168 = tpu.concatenate %103, %167 in 0 : vector<8x32xf32>, vector<8x32xf32> -> vector<16x32xf32>
    %cst_52 = arith.constant dense<0.000000e+00> : vector<16x32xf32>
    %169 = tpu.matmul %168, %38, %cst_52 {dimension_numbers = #tpu.dot_dimension_numbers<[1], [0], [0], [1], [0, 0, 1, 1], [], []>} : vector<16x32xf32>, vector<32x32xf32>, vector<16x32xf32> -> vector<16x32xf32>
    %170 = vector.broadcast %39 : vector<1x32xf32> to vector<16x32xf32>
    %171 = arith.addf %169, %170 : vector<16x32xf32>
    %172 = arith.addf %0, %171 : vector<16x32xf32>
    %c0_53 = arith.constant 0 : index
    %c192 = arith.constant 192 : index
    %173 = vector.load %arg6[%c0_53, %c192] : memref<1x544xf32, #tpu.memory_space<vmem>>, vector<1x32xf32>
    %c0_54 = arith.constant 0 : index
    %c224 = arith.constant 224 : index
    %174 = vector.load %arg6[%c0_54, %c224] : memref<1x544xf32, #tpu.memory_space<vmem>>, vector<1x32xf32>
    %cst_55 = arith.constant dense<0.000000e+00> : vector<16xf32>
    %175 = vector.multi_reduction <add>, %172, %cst_55 [1] : vector<16x32xf32> to vector<16xf32>
    %176 = vector.shape_cast %175 : vector<16xf32> to vector<16x1xf32>
    %cst_56 = arith.constant 3.200000e+01 : f32
    %177 = vector.broadcast %cst_56 : f32 to vector<16x1xf32>
    %178 = arith.divf %176, %177 : vector<16x1xf32>
    %179 = vector.broadcast %178 : vector<16x1xf32> to vector<16x32xf32>
    %180 = arith.subf %172, %179 : vector<16x32xf32>
    %181 = arith.mulf %180, %180 : vector<16x32xf32>
    %cst_57 = arith.constant dense<0.000000e+00> : vector<16xf32>
    %182 = vector.multi_reduction <add>, %181, %cst_57 [1] : vector<16x32xf32> to vector<16xf32>
    %183 = vector.shape_cast %182 : vector<16xf32> to vector<16x1xf32>
    %cst_58 = arith.constant 3.200000e+01 : f32
    %184 = vector.broadcast %cst_58 : f32 to vector<16x1xf32>
    %185 = arith.divf %183, %184 : vector<16x1xf32>
    %cst_59 = arith.constant 9.99999974E-6 : f32
    %186 = vector.broadcast %cst_59 : f32 to vector<16x1xf32>
    %187 = arith.addf %185, %186 : vector<16x1xf32>
    %188 = math.rsqrt %187 : vector<16x1xf32>
    %189 = vector.broadcast %188 : vector<16x1xf32> to vector<16x32xf32>
    %190 = arith.mulf %180, %189 : vector<16x32xf32>
    %191 = vector.broadcast %173 : vector<1x32xf32> to vector<16x32xf32>
    %192 = arith.mulf %190, %191 : vector<16x32xf32>
    %193 = vector.broadcast %174 : vector<1x32xf32> to vector<16x32xf32>
    %194 = arith.addf %192, %193 : vector<16x32xf32>
    %c0_60 = arith.constant 0 : index
    %c128 = arith.constant 128 : index
    %195 = vector.load %arg4[%c0_60, %c128] : memref<32x320xf32, #tpu.memory_space<vmem>>, vector<32x32xf32>
    %cst_61 = arith.constant dense<0.000000e+00> : vector<16x32xf32>
    %196 = tpu.matmul %194, %195, %cst_61 {dimension_numbers = #tpu.dot_dimension_numbers<[1], [0], [0], [1], [0, 0, 1, 1], [], []>} : vector<16x32xf32>, vector<32x32xf32>, vector<16x32xf32> -> vector<16x32xf32>
    %c0_62 = arith.constant 0 : index
    %c256 = arith.constant 256 : index
    %197 = vector.load %arg6[%c0_62, %c256] : memref<1x544xf32, #tpu.memory_space<vmem>>, vector<1x32xf32>
    %198 = vector.broadcast %197 : vector<1x32xf32> to vector<16x32xf32>
    %199 = arith.addf %196, %198 : vector<16x32xf32>
    %c0_63 = arith.constant 0 : index
    %c160_64 = arith.constant 160 : index
    %200 = vector.load %arg4[%c0_63, %c160_64] : memref<32x320xf32, #tpu.memory_space<vmem>>, vector<32x64xf32>
    %cst_65 = arith.constant dense<0.000000e+00> : vector<16x64xf32>
    %201 = tpu.matmul %1, %200, %cst_65 {dimension_numbers = #tpu.dot_dimension_numbers<[1], [0], [0], [1], [0, 0, 1, 1], [], []>} : vector<16x32xf32>, vector<32x64xf32>, vector<16x64xf32> -> vector<16x64xf32>
    %c0_66 = arith.constant 0 : index
    %c288 = arith.constant 288 : index
    %202 = vector.load %arg6[%c0_66, %c288] : memref<1x544xf32, #tpu.memory_space<vmem>>, vector<1x64xf32>
    %203 = vector.broadcast %202 : vector<1x64xf32> to vector<16x64xf32>
    %204 = arith.addf %201, %203 : vector<16x64xf32>
    %205 = vector.extract_strided_slice %204 {offsets = [0, 0], sizes = [16, 32], strides = [1, 1]} : vector<16x64xf32> to vector<16x32xf32>
    %206 = vector.extract_strided_slice %204 {offsets = [0, 32], sizes = [16, 32], strides = [1, 1]} : vector<16x64xf32> to vector<16x32xf32>
    %c0_67 = arith.constant 0 : index
    %c224_68 = arith.constant 224 : index
    %207 = vector.load %arg4[%c0_67, %c224_68] : memref<32x320xf32, #tpu.memory_space<vmem>>, vector<32x32xf32>
    %c0_69 = arith.constant 0 : index
    %c352 = arith.constant 352 : index
    %208 = vector.load %arg6[%c0_69, %c352] : memref<1x544xf32, #tpu.memory_space<vmem>>, vector<1x32xf32>
    %209 = vector.extract_strided_slice %199 {offsets = [0, 0], sizes = [8, 32], strides = [1, 1]} : vector<16x32xf32> to vector<8x32xf32>
    %210 = vector.extract_strided_slice %205 {offsets = [0, 0], sizes = [8, 32], strides = [1, 1]} : vector<16x32xf32> to vector<8x32xf32>
    %211 = vector.extract_strided_slice %206 {offsets = [0, 0], sizes = [8, 32], strides = [1, 1]} : vector<16x32xf32> to vector<8x32xf32>
    %212 = vector.extract_strided_slice %209 {offsets = [0, 0], sizes = [8, 8], strides = [1, 1]} : vector<8x32xf32> to vector<8x8xf32>
    %213 = vector.extract_strided_slice %210 {offsets = [0, 0], sizes = [8, 8], strides = [1, 1]} : vector<8x32xf32> to vector<8x8xf32>
    %cst_70 = arith.constant dense<0.000000e+00> : vector<8x8xf32>
    %214 = tpu.matmul %212, %213, %cst_70 {dimension_numbers = #tpu.dot_dimension_numbers<[1], [1], [0], [0], [0, 0, 1, 0], [], []>} : vector<8x8xf32>, vector<8x8xf32>, vector<8x8xf32> -> vector<8x8xf32>
    %cst_71 = arith.constant dense<0xFF800000> : vector<8xf32>
    %215 = vector.multi_reduction <maximumf>, %214, %cst_71 [1] : vector<8x8xf32> to vector<8xf32>
    %216 = vector.shape_cast %215 : vector<8xf32> to vector<8x1xf32>
    %217 = vector.broadcast %216 : vector<8x1xf32> to vector<8x8xf32>
    %218 = arith.subf %214, %217 : vector<8x8xf32>
    %219 = math.exp %218 : vector<8x8xf32>
    %cst_72 = arith.constant dense<0.000000e+00> : vector<8xf32>
    %220 = vector.multi_reduction <add>, %219, %cst_72 [1] : vector<8x8xf32> to vector<8xf32>
    %221 = vector.shape_cast %220 : vector<8xf32> to vector<8x1xf32>
    %222 = vector.broadcast %221 : vector<8x1xf32> to vector<8x8xf32>
    %223 = arith.divf %219, %222 : vector<8x8xf32>
    %224 = vector.extract_strided_slice %211 {offsets = [0, 0], sizes = [8, 8], strides = [1, 1]} : vector<8x32xf32> to vector<8x8xf32>
    %cst_73 = arith.constant dense<0.000000e+00> : vector<8x8xf32>
    %225 = tpu.matmul %223, %224, %cst_73 {dimension_numbers = #tpu.dot_dimension_numbers<[1], [0], [0], [1], [0, 0, 1, 1], [], []>} : vector<8x8xf32>, vector<8x8xf32>, vector<8x8xf32> -> vector<8x8xf32>
    %226 = vector.extract_strided_slice %209 {offsets = [0, 8], sizes = [8, 8], strides = [1, 1]} : vector<8x32xf32> to vector<8x8xf32>
    %227 = vector.extract_strided_slice %210 {offsets = [0, 8], sizes = [8, 8], strides = [1, 1]} : vector<8x32xf32> to vector<8x8xf32>
    %cst_74 = arith.constant dense<0.000000e+00> : vector<8x8xf32>
    %228 = tpu.matmul %226, %227, %cst_74 {dimension_numbers = #tpu.dot_dimension_numbers<[1], [1], [0], [0], [0, 0, 1, 0], [], []>} : vector<8x8xf32>, vector<8x8xf32>, vector<8x8xf32> -> vector<8x8xf32>
    %cst_75 = arith.constant dense<0xFF800000> : vector<8xf32>
    %229 = vector.multi_reduction <maximumf>, %228, %cst_75 [1] : vector<8x8xf32> to vector<8xf32>
    %230 = vector.shape_cast %229 : vector<8xf32> to vector<8x1xf32>
    %231 = vector.broadcast %230 : vector<8x1xf32> to vector<8x8xf32>
    %232 = arith.subf %228, %231 : vector<8x8xf32>
    %233 = math.exp %232 : vector<8x8xf32>
    %cst_76 = arith.constant dense<0.000000e+00> : vector<8xf32>
    %234 = vector.multi_reduction <add>, %233, %cst_76 [1] : vector<8x8xf32> to vector<8xf32>
    %235 = vector.shape_cast %234 : vector<8xf32> to vector<8x1xf32>
    %236 = vector.broadcast %235 : vector<8x1xf32> to vector<8x8xf32>
    %237 = arith.divf %233, %236 : vector<8x8xf32>
    %238 = vector.extract_strided_slice %211 {offsets = [0, 8], sizes = [8, 8], strides = [1, 1]} : vector<8x32xf32> to vector<8x8xf32>
    %cst_77 = arith.constant dense<0.000000e+00> : vector<8x8xf32>
    %239 = tpu.matmul %237, %238, %cst_77 {dimension_numbers = #tpu.dot_dimension_numbers<[1], [0], [0], [1], [0, 0, 1, 1], [], []>} : vector<8x8xf32>, vector<8x8xf32>, vector<8x8xf32> -> vector<8x8xf32>
    %240 = vector.extract_strided_slice %209 {offsets = [0, 16], sizes = [8, 8], strides = [1, 1]} : vector<8x32xf32> to vector<8x8xf32>
    %241 = vector.extract_strided_slice %210 {offsets = [0, 16], sizes = [8, 8], strides = [1, 1]} : vector<8x32xf32> to vector<8x8xf32>
    %cst_78 = arith.constant dense<0.000000e+00> : vector<8x8xf32>
    %242 = tpu.matmul %240, %241, %cst_78 {dimension_numbers = #tpu.dot_dimension_numbers<[1], [1], [0], [0], [0, 0, 1, 0], [], []>} : vector<8x8xf32>, vector<8x8xf32>, vector<8x8xf32> -> vector<8x8xf32>
    %cst_79 = arith.constant dense<0xFF800000> : vector<8xf32>
    %243 = vector.multi_reduction <maximumf>, %242, %cst_79 [1] : vector<8x8xf32> to vector<8xf32>
    %244 = vector.shape_cast %243 : vector<8xf32> to vector<8x1xf32>
    %245 = vector.broadcast %244 : vector<8x1xf32> to vector<8x8xf32>
    %246 = arith.subf %242, %245 : vector<8x8xf32>
    %247 = math.exp %246 : vector<8x8xf32>
    %cst_80 = arith.constant dense<0.000000e+00> : vector<8xf32>
    %248 = vector.multi_reduction <add>, %247, %cst_80 [1] : vector<8x8xf32> to vector<8xf32>
    %249 = vector.shape_cast %248 : vector<8xf32> to vector<8x1xf32>
    %250 = vector.broadcast %249 : vector<8x1xf32> to vector<8x8xf32>
    %251 = arith.divf %247, %250 : vector<8x8xf32>
    %252 = vector.extract_strided_slice %211 {offsets = [0, 16], sizes = [8, 8], strides = [1, 1]} : vector<8x32xf32> to vector<8x8xf32>
    %cst_81 = arith.constant dense<0.000000e+00> : vector<8x8xf32>
    %253 = tpu.matmul %251, %252, %cst_81 {dimension_numbers = #tpu.dot_dimension_numbers<[1], [0], [0], [1], [0, 0, 1, 1], [], []>} : vector<8x8xf32>, vector<8x8xf32>, vector<8x8xf32> -> vector<8x8xf32>
    %254 = vector.extract_strided_slice %209 {offsets = [0, 24], sizes = [8, 8], strides = [1, 1]} : vector<8x32xf32> to vector<8x8xf32>
    %255 = vector.extract_strided_slice %210 {offsets = [0, 24], sizes = [8, 8], strides = [1, 1]} : vector<8x32xf32> to vector<8x8xf32>
    %cst_82 = arith.constant dense<0.000000e+00> : vector<8x8xf32>
    %256 = tpu.matmul %254, %255, %cst_82 {dimension_numbers = #tpu.dot_dimension_numbers<[1], [1], [0], [0], [0, 0, 1, 0], [], []>} : vector<8x8xf32>, vector<8x8xf32>, vector<8x8xf32> -> vector<8x8xf32>
    %cst_83 = arith.constant dense<0xFF800000> : vector<8xf32>
    %257 = vector.multi_reduction <maximumf>, %256, %cst_83 [1] : vector<8x8xf32> to vector<8xf32>
    %258 = vector.shape_cast %257 : vector<8xf32> to vector<8x1xf32>
    %259 = vector.broadcast %258 : vector<8x1xf32> to vector<8x8xf32>
    %260 = arith.subf %256, %259 : vector<8x8xf32>
    %261 = math.exp %260 : vector<8x8xf32>
    %cst_84 = arith.constant dense<0.000000e+00> : vector<8xf32>
    %262 = vector.multi_reduction <add>, %261, %cst_84 [1] : vector<8x8xf32> to vector<8xf32>
    %263 = vector.shape_cast %262 : vector<8xf32> to vector<8x1xf32>
    %264 = vector.broadcast %263 : vector<8x1xf32> to vector<8x8xf32>
    %265 = arith.divf %261, %264 : vector<8x8xf32>
    %266 = vector.extract_strided_slice %211 {offsets = [0, 24], sizes = [8, 8], strides = [1, 1]} : vector<8x32xf32> to vector<8x8xf32>
    %cst_85 = arith.constant dense<0.000000e+00> : vector<8x8xf32>
    %267 = tpu.matmul %265, %266, %cst_85 {dimension_numbers = #tpu.dot_dimension_numbers<[1], [0], [0], [1], [0, 0, 1, 1], [], []>} : vector<8x8xf32>, vector<8x8xf32>, vector<8x8xf32> -> vector<8x8xf32>
    %268 = tpu.concatenate %225, %239, %253, %267 in 1 : vector<8x8xf32>, vector<8x8xf32>, vector<8x8xf32>, vector<8x8xf32> -> vector<8x32xf32>
    %269 = vector.extract_strided_slice %199 {offsets = [8, 0], sizes = [8, 32], strides = [1, 1]} : vector<16x32xf32> to vector<8x32xf32>
    %270 = vector.extract_strided_slice %205 {offsets = [8, 0], sizes = [8, 32], strides = [1, 1]} : vector<16x32xf32> to vector<8x32xf32>
    %271 = vector.extract_strided_slice %206 {offsets = [8, 0], sizes = [8, 32], strides = [1, 1]} : vector<16x32xf32> to vector<8x32xf32>
    %272 = vector.extract_strided_slice %269 {offsets = [0, 0], sizes = [8, 8], strides = [1, 1]} : vector<8x32xf32> to vector<8x8xf32>
    %273 = vector.extract_strided_slice %270 {offsets = [0, 0], sizes = [8, 8], strides = [1, 1]} : vector<8x32xf32> to vector<8x8xf32>
    %cst_86 = arith.constant dense<0.000000e+00> : vector<8x8xf32>
    %274 = tpu.matmul %272, %273, %cst_86 {dimension_numbers = #tpu.dot_dimension_numbers<[1], [1], [0], [0], [0, 0, 1, 0], [], []>} : vector<8x8xf32>, vector<8x8xf32>, vector<8x8xf32> -> vector<8x8xf32>
    %cst_87 = arith.constant dense<0xFF800000> : vector<8xf32>
    %275 = vector.multi_reduction <maximumf>, %274, %cst_87 [1] : vector<8x8xf32> to vector<8xf32>
    %276 = vector.shape_cast %275 : vector<8xf32> to vector<8x1xf32>
    %277 = vector.broadcast %276 : vector<8x1xf32> to vector<8x8xf32>
    %278 = arith.subf %274, %277 : vector<8x8xf32>
    %279 = math.exp %278 : vector<8x8xf32>
    %cst_88 = arith.constant dense<0.000000e+00> : vector<8xf32>
    %280 = vector.multi_reduction <add>, %279, %cst_88 [1] : vector<8x8xf32> to vector<8xf32>
    %281 = vector.shape_cast %280 : vector<8xf32> to vector<8x1xf32>
    %282 = vector.broadcast %281 : vector<8x1xf32> to vector<8x8xf32>
    %283 = arith.divf %279, %282 : vector<8x8xf32>
    %284 = vector.extract_strided_slice %271 {offsets = [0, 0], sizes = [8, 8], strides = [1, 1]} : vector<8x32xf32> to vector<8x8xf32>
    %cst_89 = arith.constant dense<0.000000e+00> : vector<8x8xf32>
    %285 = tpu.matmul %283, %284, %cst_89 {dimension_numbers = #tpu.dot_dimension_numbers<[1], [0], [0], [1], [0, 0, 1, 1], [], []>} : vector<8x8xf32>, vector<8x8xf32>, vector<8x8xf32> -> vector<8x8xf32>
    %286 = vector.extract_strided_slice %269 {offsets = [0, 8], sizes = [8, 8], strides = [1, 1]} : vector<8x32xf32> to vector<8x8xf32>
    %287 = vector.extract_strided_slice %270 {offsets = [0, 8], sizes = [8, 8], strides = [1, 1]} : vector<8x32xf32> to vector<8x8xf32>
    %cst_90 = arith.constant dense<0.000000e+00> : vector<8x8xf32>
    %288 = tpu.matmul %286, %287, %cst_90 {dimension_numbers = #tpu.dot_dimension_numbers<[1], [1], [0], [0], [0, 0, 1, 0], [], []>} : vector<8x8xf32>, vector<8x8xf32>, vector<8x8xf32> -> vector<8x8xf32>
    %cst_91 = arith.constant dense<0xFF800000> : vector<8xf32>
    %289 = vector.multi_reduction <maximumf>, %288, %cst_91 [1] : vector<8x8xf32> to vector<8xf32>
    %290 = vector.shape_cast %289 : vector<8xf32> to vector<8x1xf32>
    %291 = vector.broadcast %290 : vector<8x1xf32> to vector<8x8xf32>
    %292 = arith.subf %288, %291 : vector<8x8xf32>
    %293 = math.exp %292 : vector<8x8xf32>
    %cst_92 = arith.constant dense<0.000000e+00> : vector<8xf32>
    %294 = vector.multi_reduction <add>, %293, %cst_92 [1] : vector<8x8xf32> to vector<8xf32>
    %295 = vector.shape_cast %294 : vector<8xf32> to vector<8x1xf32>
    %296 = vector.broadcast %295 : vector<8x1xf32> to vector<8x8xf32>
    %297 = arith.divf %293, %296 : vector<8x8xf32>
    %298 = vector.extract_strided_slice %271 {offsets = [0, 8], sizes = [8, 8], strides = [1, 1]} : vector<8x32xf32> to vector<8x8xf32>
    %cst_93 = arith.constant dense<0.000000e+00> : vector<8x8xf32>
    %299 = tpu.matmul %297, %298, %cst_93 {dimension_numbers = #tpu.dot_dimension_numbers<[1], [0], [0], [1], [0, 0, 1, 1], [], []>} : vector<8x8xf32>, vector<8x8xf32>, vector<8x8xf32> -> vector<8x8xf32>
    %300 = vector.extract_strided_slice %269 {offsets = [0, 16], sizes = [8, 8], strides = [1, 1]} : vector<8x32xf32> to vector<8x8xf32>
    %301 = vector.extract_strided_slice %270 {offsets = [0, 16], sizes = [8, 8], strides = [1, 1]} : vector<8x32xf32> to vector<8x8xf32>
    %cst_94 = arith.constant dense<0.000000e+00> : vector<8x8xf32>
    %302 = tpu.matmul %300, %301, %cst_94 {dimension_numbers = #tpu.dot_dimension_numbers<[1], [1], [0], [0], [0, 0, 1, 0], [], []>} : vector<8x8xf32>, vector<8x8xf32>, vector<8x8xf32> -> vector<8x8xf32>
    %cst_95 = arith.constant dense<0xFF800000> : vector<8xf32>
    %303 = vector.multi_reduction <maximumf>, %302, %cst_95 [1] : vector<8x8xf32> to vector<8xf32>
    %304 = vector.shape_cast %303 : vector<8xf32> to vector<8x1xf32>
    %305 = vector.broadcast %304 : vector<8x1xf32> to vector<8x8xf32>
    %306 = arith.subf %302, %305 : vector<8x8xf32>
    %307 = math.exp %306 : vector<8x8xf32>
    %cst_96 = arith.constant dense<0.000000e+00> : vector<8xf32>
    %308 = vector.multi_reduction <add>, %307, %cst_96 [1] : vector<8x8xf32> to vector<8xf32>
    %309 = vector.shape_cast %308 : vector<8xf32> to vector<8x1xf32>
    %310 = vector.broadcast %309 : vector<8x1xf32> to vector<8x8xf32>
    %311 = arith.divf %307, %310 : vector<8x8xf32>
    %312 = vector.extract_strided_slice %271 {offsets = [0, 16], sizes = [8, 8], strides = [1, 1]} : vector<8x32xf32> to vector<8x8xf32>
    %cst_97 = arith.constant dense<0.000000e+00> : vector<8x8xf32>
    %313 = tpu.matmul %311, %312, %cst_97 {dimension_numbers = #tpu.dot_dimension_numbers<[1], [0], [0], [1], [0, 0, 1, 1], [], []>} : vector<8x8xf32>, vector<8x8xf32>, vector<8x8xf32> -> vector<8x8xf32>
    %314 = vector.extract_strided_slice %269 {offsets = [0, 24], sizes = [8, 8], strides = [1, 1]} : vector<8x32xf32> to vector<8x8xf32>
    %315 = vector.extract_strided_slice %270 {offsets = [0, 24], sizes = [8, 8], strides = [1, 1]} : vector<8x32xf32> to vector<8x8xf32>
    %cst_98 = arith.constant dense<0.000000e+00> : vector<8x8xf32>
    %316 = tpu.matmul %314, %315, %cst_98 {dimension_numbers = #tpu.dot_dimension_numbers<[1], [1], [0], [0], [0, 0, 1, 0], [], []>} : vector<8x8xf32>, vector<8x8xf32>, vector<8x8xf32> -> vector<8x8xf32>
    %cst_99 = arith.constant dense<0xFF800000> : vector<8xf32>
    %317 = vector.multi_reduction <maximumf>, %316, %cst_99 [1] : vector<8x8xf32> to vector<8xf32>
    %318 = vector.shape_cast %317 : vector<8xf32> to vector<8x1xf32>
    %319 = vector.broadcast %318 : vector<8x1xf32> to vector<8x8xf32>
    %320 = arith.subf %316, %319 : vector<8x8xf32>
    %321 = math.exp %320 : vector<8x8xf32>
    %cst_100 = arith.constant dense<0.000000e+00> : vector<8xf32>
    %322 = vector.multi_reduction <add>, %321, %cst_100 [1] : vector<8x8xf32> to vector<8xf32>
    %323 = vector.shape_cast %322 : vector<8xf32> to vector<8x1xf32>
    %324 = vector.broadcast %323 : vector<8x1xf32> to vector<8x8xf32>
    %325 = arith.divf %321, %324 : vector<8x8xf32>
    %326 = vector.extract_strided_slice %271 {offsets = [0, 24], sizes = [8, 8], strides = [1, 1]} : vector<8x32xf32> to vector<8x8xf32>
    %cst_101 = arith.constant dense<0.000000e+00> : vector<8x8xf32>
    %327 = tpu.matmul %325, %326, %cst_101 {dimension_numbers = #tpu.dot_dimension_numbers<[1], [0], [0], [1], [0, 0, 1, 1], [], []>} : vector<8x8xf32>, vector<8x8xf32>, vector<8x8xf32> -> vector<8x8xf32>
    %328 = tpu.concatenate %285, %299, %313, %327 in 1 : vector<8x8xf32>, vector<8x8xf32>, vector<8x8xf32>, vector<8x8xf32> -> vector<8x32xf32>
    %329 = tpu.concatenate %268, %328 in 0 : vector<8x32xf32>, vector<8x32xf32> -> vector<16x32xf32>
    %cst_102 = arith.constant dense<0.000000e+00> : vector<16x32xf32>
    %330 = tpu.matmul %329, %207, %cst_102 {dimension_numbers = #tpu.dot_dimension_numbers<[1], [0], [0], [1], [0, 0, 1, 1], [], []>} : vector<16x32xf32>, vector<32x32xf32>, vector<16x32xf32> -> vector<16x32xf32>
    %331 = vector.broadcast %208 : vector<1x32xf32> to vector<16x32xf32>
    %332 = arith.addf %330, %331 : vector<16x32xf32>
    %333 = arith.addf %172, %332 : vector<16x32xf32>
    %c0_103 = arith.constant 0 : index
    %c384 = arith.constant 384 : index
    %334 = vector.load %arg6[%c0_103, %c384] : memref<1x544xf32, #tpu.memory_space<vmem>>, vector<1x32xf32>
    %c0_104 = arith.constant 0 : index
    %c416 = arith.constant 416 : index
    %335 = vector.load %arg6[%c0_104, %c416] : memref<1x544xf32, #tpu.memory_space<vmem>>, vector<1x32xf32>
    %cst_105 = arith.constant dense<0.000000e+00> : vector<16xf32>
    %336 = vector.multi_reduction <add>, %333, %cst_105 [1] : vector<16x32xf32> to vector<16xf32>
    %337 = vector.shape_cast %336 : vector<16xf32> to vector<16x1xf32>
    %cst_106 = arith.constant 3.200000e+01 : f32
    %338 = vector.broadcast %cst_106 : f32 to vector<16x1xf32>
    %339 = arith.divf %337, %338 : vector<16x1xf32>
    %340 = vector.broadcast %339 : vector<16x1xf32> to vector<16x32xf32>
    %341 = arith.subf %333, %340 : vector<16x32xf32>
    %342 = arith.mulf %341, %341 : vector<16x32xf32>
    %cst_107 = arith.constant dense<0.000000e+00> : vector<16xf32>
    %343 = vector.multi_reduction <add>, %342, %cst_107 [1] : vector<16x32xf32> to vector<16xf32>
    %344 = vector.shape_cast %343 : vector<16xf32> to vector<16x1xf32>
    %cst_108 = arith.constant 3.200000e+01 : f32
    %345 = vector.broadcast %cst_108 : f32 to vector<16x1xf32>
    %346 = arith.divf %344, %345 : vector<16x1xf32>
    %cst_109 = arith.constant 9.99999974E-6 : f32
    %347 = vector.broadcast %cst_109 : f32 to vector<16x1xf32>
    %348 = arith.addf %346, %347 : vector<16x1xf32>
    %349 = math.rsqrt %348 : vector<16x1xf32>
    %350 = vector.broadcast %349 : vector<16x1xf32> to vector<16x32xf32>
    %351 = arith.mulf %341, %350 : vector<16x32xf32>
    %352 = vector.broadcast %334 : vector<1x32xf32> to vector<16x32xf32>
    %353 = arith.mulf %351, %352 : vector<16x32xf32>
    %354 = vector.broadcast %335 : vector<1x32xf32> to vector<16x32xf32>
    %355 = arith.addf %353, %354 : vector<16x32xf32>
    %c0_110 = arith.constant 0 : index
    %c256_111 = arith.constant 256 : index
    %356 = vector.load %arg4[%c0_110, %c256_111] : memref<32x320xf32, #tpu.memory_space<vmem>>, vector<32x64xf32>
    %cst_112 = arith.constant dense<0.000000e+00> : vector<16x64xf32>
    %357 = tpu.matmul %355, %356, %cst_112 {dimension_numbers = #tpu.dot_dimension_numbers<[1], [0], [0], [1], [0, 0, 1, 1], [], []>} : vector<16x32xf32>, vector<32x64xf32>, vector<16x64xf32> -> vector<16x64xf32>
    %c0_113 = arith.constant 0 : index
    %c448 = arith.constant 448 : index
    %358 = vector.load %arg6[%c0_113, %c448] : memref<1x544xf32, #tpu.memory_space<vmem>>, vector<1x64xf32>
    %359 = vector.broadcast %358 : vector<1x64xf32> to vector<16x64xf32>
    %360 = arith.addf %357, %359 : vector<16x64xf32>
    %cst_114 = arith.constant 0.000000e+00 : f32
    %361 = vector.broadcast %cst_114 : f32 to vector<16x64xf32>
    %362 = arith.cmpf ogt, %360, %361 : vector<16x64xf32>
    %cst_115 = arith.constant 0.000000e+00 : f32
    %363 = vector.broadcast %cst_115 : f32 to vector<16x64xf32>
    %364 = arith.minimumf %360, %363 : vector<16x64xf32>
    %365 = math.exp %364 : vector<16x64xf32>
    %cst_116 = arith.constant 1.000000e+00 : f32
    %366 = vector.broadcast %cst_116 : f32 to vector<16x64xf32>
    %367 = arith.subf %365, %366 : vector<16x64xf32>
    %368 = arith.select %362, %360, %367 : vector<16x64xi1>, vector<16x64xf32>
    %c0_117 = arith.constant 0 : index
    %c0_118 = arith.constant 0 : index
    %369 = vector.load %arg5[%c0_117, %c0_118] : memref<64x32xf32, #tpu.memory_space<vmem>>, vector<64x32xf32>
    %cst_119 = arith.constant dense<0.000000e+00> : vector<16x32xf32>
    %370 = tpu.matmul %368, %369, %cst_119 {dimension_numbers = #tpu.dot_dimension_numbers<[1], [0], [0], [1], [0, 0, 1, 1], [], []>} : vector<16x64xf32>, vector<64x32xf32>, vector<16x32xf32> -> vector<16x32xf32>
    %c0_120 = arith.constant 0 : index
    %c512 = arith.constant 512 : index
    %371 = vector.load %arg6[%c0_120, %c512] : memref<1x544xf32, #tpu.memory_space<vmem>>, vector<1x32xf32>
    %372 = vector.broadcast %371 : vector<1x32xf32> to vector<16x32xf32>
    %373 = arith.addf %370, %372 : vector<16x32xf32>
    %374 = arith.addf %333, %373 : vector<16x32xf32>
    %c0_121 = arith.constant 0 : index
    %c0_122 = arith.constant 0 : index
    %375 = vector.load %arg7[%c0_121, %c0_122] : memref<16x32xf32, #tpu.memory_space<vmem>>, vector<16x32xf32>
    tpu.vector_store %arg7[%c0_121, %c0_122], %374 {strides = array<i32>} : memref<16x32xf32, #tpu.memory_space<vmem>>, vector<16x32xf32>,
    return
  }
  func.func @transform_0(%arg0: i32) -> (i32, i32) {
    %c0_i32 = arith.constant 0 : i32
    %c0_i32_0 = arith.constant 0 : i32
    %c0_i32_1 = arith.constant 0 : i32
    return %c0_i32, %c0_i32_0 : i32, i32
  }
  func.func @transform_1(%arg0: i32) -> (i32, i32) {
    %c0_i32 = arith.constant 0 : i32
    %c0_i32_0 = arith.constant 0 : i32
    %c0_i32_1 = arith.constant 0 : i32
    return %c0_i32, %c0_i32_0 : i32, i32
  }
  func.func @transform_2(%arg0: i32) -> (i32, i32) {
    %c0_i32 = arith.constant 0 : i32
    %c0_i32_0 = arith.constant 0 : i32
    %c0_i32_1 = arith.constant 0 : i32
    return %c0_i32, %c0_i32_0 : i32, i32
  }
  func.func @transform_3(%arg0: i32) -> (i32, i32) {
    %c0_i32 = arith.constant 0 : i32
    %c0_i32_0 = arith.constant 0 : i32
    %c0_i32_1 = arith.constant 0 : i32
    return %c0_i32, %c0_i32_0 : i32, i32
  }
  func.func @transform_4(%arg0: i32) -> (i32, i32) {
    %c0_i32 = arith.constant 0 : i32
    %c0_i32_0 = arith.constant 0 : i32
    %c0_i32_1 = arith.constant 0 : i32
    return %c0_i32, %c0_i32_0 : i32, i32
  }
  func.func @transform_5(%arg0: i32) -> (i32, i32) {
    %c0_i32 = arith.constant 0 : i32
    %c0_i32_0 = arith.constant 0 : i32
    %c0_i32_1 = arith.constant 0 : i32
    return %c0_i32, %c0_i32_0 : i32, i32
  }
  func.func @transform_6(%arg0: i32) -> (i32, i32) {
    %c0_i32 = arith.constant 0 : i32
    %c0_i32_0 = arith.constant 0 : i32
    %c0_i32_1 = arith.constant 0 : i32
    return %c0_i32, %c0_i32_0 : i32, i32
  }
}

</mosaic_0001>

<bundles_post_ra>
// kernel: decoder_layer.1
= control target key start
LH: loop header
LB: loop body
LE: loop exit
PB: predicated region body
PF: predicated region fallthrough
CT: control target
= control target key end

     0   :  { %11 = vsyncpa [#allocation3], 0  ;;  %s4840_s0 = inlined_call_operand.vmem [shape: f32[16,32], index: 0, kind: input, shape index: {}]   ;;  %s4841_s1 = inlined_call_operand.vmem [shape: f32[16,32], index: 1, kind: input, shape index: {}]   ;;  %s4842_s2 = inlined_call_operand.vmem [shape: s32[8,8], index: 2, kind: input, shape index: {}]   ;;  %s4843_s3 = inlined_call_operand.vmem [shape: f32[32,320], index: 3, kind: input, shape index: {}]   ;;  %s4844_s4 = inlined_call_operand.vmem [shape: f32[64,32], index: 4, kind: input, shape index: {}]   ;;  %s4845_s5 = inlined_call_operand.hbm [shape: f32[1,544], index: 5, kind: input, shape index: {}]   ;;  %s4846_s6 = inlined_call_operand.hbm [shape: f32[16,32], index: 6, kind: output, shape index: {}]  }
   0x1   :  { %12 = vsyncpa [#allocation4], 0  ;;  %s4242_s21 = smov [#allocation2]   ;;  %s4194_s25 = scalar_lea.hbm %s4845_s5, 80 }
   0x2   :  { %s29_s22 = sshll.u32 %s4242_s21, 4  ;;  %p4195_p0 = scmp.ne.s32.totalorder %s4845_s5, %s4194_s25  ;;  %s30_s22 = int_to_ptr.vmem [resolvable:$true] %s29_s22 }
   0x3   :  { %p4198_p1 = scmp.lt.u32.totalorder %s4194_s25, %s4845_s5 }
   0x5   :  { %p4200_p2 = pnand %p4198_p1, %p4195_p0 }
   0x7   :  { %4203 = shalt.err (!%p4200_p2)
}
   0x8   :  { %s4204_s30 = scalar_lea.vmem %s30_s22, 80  ;;  %s4208_s7 = scalar_lea.vmem %s30_s22, 96 }
   0x9   :  { %p4205_p3 = scmp.ne.s32.totalorder %s30_s22, %s4204_s30  ;;  %p4209_p4 = scmp.lt.s32.totalorder %s30_s22, %s30_s22 }
   0xa   :  { %p4210_p5 = scmp.lt.s32.totalorder %s4208_s7, %s4204_s30 }
   0xc   :  { %p4211_p6 = por %p4210_p5, %p4209_p4 }
   0xe   :  { %p4212_p7 = pnand %p4211_p6, %p4205_p3 }
  0x10   :  { %4215 = shalt.err (!%p4212_p7)
}
  0x11   :  { %32 = dma.hbm_to_vmem [thread:$0]  %s4845_s5, 80, %s30_s22, [#allocation3]  }
  0x12   :  { %4238 = dma.done.wait [#allocation3], 80  }
  0x13   :  { %4239 = vsyncadd [#allocation3], 4294967216  ;;  %vm44_vm0 = vcmask 261120   ;;  %v4313_v0 = vld [vmem:[%s4840_s0] sm:$0xff]  ;;  %v4318_v1 = vld [vmem:[%s4840_s0 + $0x8] sm:$0xff]  ;;  %s4243_s5 = smov 96   ;;  %v91_v22 = vlaneseq }
  0x14   :  { %v45_v2 = vsel %vm44_vm0, %v4313_v0, 0.0  ;;  %v48_v3 = vsel %vm44_vm0, %v4318_v1, 0.0  ;;  %v3575_v4 = vld [vmem:[#allocation2] ss:$0 sm:$0xff]  ;;  %v4337_v16 = vld [vmem:[%s4843_s3 + $0x18] sm:$0xff]  ;;  %v4346_v19 = vld [vmem:[%s4843_s3 + $0x30] sm:$0xff] }
  0x15   :  { %46 = vadd.xlane.f32.xlu0 %v45_v2  ;;  %v4332_v15 = vld [vmem:[%s4843_s3] sm:$0xff]  ;;  %v4351_v20 = vld [vmem:[%s4843_s3 + $0x48] sm:$0xff]  ;;  %v92_v23 = vshrl.u32 %v91_v22, 7  ;;  %s4244_s21 = smov 64   ;;  %v4245_v44 = vmov 0.0   ;;  %vm4246_vm1 = vmmov 0  }
  0x16   :  { %v4084_v17 = vpack.i.bf16 %v4337_v16, %v4332_v15  ;;  %v3999_v18 = vpack.c.bf16 %v4337_v16, %v4332_v15  ;;  %v4003_v21 = vpack.c.bf16 %v4351_v20, %v4346_v19  ;;  %v89_v24 = vld [vmem:[#allocation2] sm:$0x3]  ;;  %3775 = vmatprep.subr.mxu0 %v4245_v44  ;;  %3777 = vmatprep.mubr.msk.f32.mxu0 %vm4246_vm1, %v4245_v44  ;;  %vm103_vm2 = vcmask 523264   ;;  %s4247_s22 = smov 88   ;;  %s4248_s23 = smov 80  }
  0x17   :  { %v93_v25 = vsub.s32 0, %v92_v23  ;;  %v97_v26 = vsub.s32 1, %v92_v23  ;;  %s4249_s24 = smov 120   ;;  %s4250_s25 = smov 72   ;;  %vm191_vm3 = vcmask 64512   ;;  %vm861_vm5 = vcmask 130048  }
  0x18   :  { %4000 = vmatprep.subr.bf16.mxu1 %v3999_v18  ;;  %s4251_s26 = smov 112   ;;  %s4252_s27 = smov 104   ;;  %vm863_vm6 = vcmask 195584  }
  0x19   :  { %49 = vadd.xlane.f32.xlu0 %v48_v3  ;;  %4002 = vmatpush3.bf16.msra.mxu1 %v3999_v18  ;;  %v94_v27 = vrot.slane %v89_v24, %v93_v25  ;;  %v98_v28 = vrot.slane %v89_v24, %v97_v26  ;;  %s4255_s30 = smov 48   ;;  %s4256_s7 = smov 40  }
  0x1a   :  { %4004 = vmatprep.subr.bf16.mxu1 %v4003_v21  ;;  %s4257_s8 = smov 32   ;;  %s4258_s9 = smov 8  }
  0x1b   :  { %s4259_s10 = smov 16   ;;  %s4260_s11 = smov 24  }
  0x1d   :  { %4006 = vmatpush3.bf16.msra.mxu1 %v4003_v21 }
  0x1e   :  { %3765 = vmatprep.subr.mxu1 %v4245_v44 }
  0x2f   :  { %80 = vrot.lane.b32.xlu0 %v3575_v4, %s4243_s5 }
  0xa2   :  { %v47_v5 = vpop.xlane.xlu0 %46 }
  0xa3   :  { %v52_v6 = vmul.f32 0.03125, %v47_v5  ;;  %v4253_v5 = vmov -1e+09  }
  0xa5   :  { %v54_v7 = vsub.f32 %v4313_v0, %v52_v6 }
  0xa6   :  { %v50_v8 = vpop.xlane.xlu0 %49 }
  0xa7   :  { %v53_v9 = vmul.f32 0.03125, %v50_v8  ;;  %v56_v10 = vmul.f32 %v54_v7, %v54_v7 }
  0xa9   :  { %v55_v11 = vsub.f32 %v4318_v1, %v53_v9  ;;  %v58_v12 = vsel %vm44_vm0, %v56_v10, 0.0 }
  0xaa   :  { %59 = vadd.xlane.f32.xlu1 %v58_v12  ;;  %v81_v37 = vpop.permute.xlu0 %80 }
  0xab   :  { %v57_v13 = vmul.f32 %v55_v11, %v55_v11 }
  0xad   :  { %v61_v14 = vsel %vm44_vm0, %v57_v13, 0.0 }
  0xae   :  { %62 = vadd.xlane.f32.xlu1 %v61_v14 }
  0xbf   :  { %99 = vrot.lane.b32.xlu1 %v94_v27, %s4244_s21 }
  0xc3   :  { %101 = vrot.lane.b32.xlu1 %v98_v28, %s4244_s21 }
 0x137   :  { %v60_v29 = vpop.xlane.xlu1 %59 }
 0x138   :  { %v64_v30 = vmul.f32 0.03125, %v60_v29 }
 0x13a   :  { %v66_v31 = vadd.f32 1e-05, %v64_v30 }
 0x13b   :  { %v63_v32 = vpop.xlane.xlu1 %62 }
 0x13c   :  { %4114 = vrsqrt.f32 %v66_v31  ;;  %v65_v33 = vmul.f32 0.03125, %v63_v32 }
 0x13e   :  { %v67_v34 = vadd.f32 1e-05, %v65_v33 }
 0x13f   :  { %v100_v45 = vpop.permute.xlu1 %99 }
 0x140   :  { %4116 = vrsqrt.f32 %v67_v34 }
 0x143   :  { %v102_v46 = vpop.permute.xlu1 %101 }
 0x144   :  { %v104_v48 = vsel %vm103_vm2, %v100_v45, %v102_v46 }
 0x146   :  { %v4115_v35 = vpop.eup %4114 }
 0x147   :  { %v70_v36 = vmul.f32 %v4115_v35, %v54_v7 }
 0x149   :  { %v78_v38 = vmul.f32 %v3575_v4, %v70_v36 }
 0x14a   :  { %v4117_v39 = vpop.eup %4116 }
 0x14b   :  { %v71_v40 = vmul.f32 %v4117_v39, %v55_v11  ;;  %v83_v41 = vadd.f32 %v81_v37, %v78_v38 }
 0x14d   :  { %v79_v42 = vmul.f32 %v3575_v4, %v71_v40  ;;  %3762 = vmatprep.mubr.msk.f32.mxu1 %vm44_vm0, %v83_v41  ;;  %v40_v4 = vld [vmem:[%s4842_s2] sm:$0xff]  ;;  %s4254_s2 = smov 56  }
 0x14e   :  { %vm41_vm4 = vcmp.ne.s32.totalorder %v40_v4, 0 }
 0x14f   :  { %v84_v43 = vadd.f32 %v81_v37, %v79_v42  ;;  %v42_v6 = vsel %vm41_vm4, 0.0, %v4253_v5 }
 0x151   :  { %3763 = vmatmul.mubr.msk.f32.vlgmr.msra.gmra.mrb[0].mxu1 %vm44_vm0, %v84_v43 }
 0x152   :  { %3767 = vmatprep.mubr.msk.f32.mxu1 %vm4246_vm1, %v4245_v44 }
 0x224   :  { %v3764_v47 = vpop.f32.mrb[0].mxu1 }
 0x225   :  { %v178_v49 = vpop.f32.mrb[1].mxu1  ;;  %v4380_v51 = vadd.f32 %v3764_v47, %v104_v48 }
 0x226   :  { %v4366_v50 = vadd.f32 %v178_v49, %v104_v48 }
 0x228   :  { %355 = vrot.lane.b32.xlu0 %v4366_v50, %s4247_s22  ;;  %189 = vrot.lane.b32.xlu1 %v4366_v50, %s4243_s5 }
 0x22c   :  { %520 = vrot.lane.b32.xlu0 %v4366_v50, %s4248_s23  ;;  %353 = vrot.lane.b32.xlu1 %v4366_v50, %s4249_s24 }
 0x230   :  { %685 = vrot.lane.b32.xlu0 %v4366_v50, %s4250_s25  ;;  %518 = vrot.lane.b32.xlu1 %v4366_v50, %s4251_s26 }
 0x234   :  { %866 = vrot.lane.b32.xlu0 %v4380_v51, %s4243_s5  ;;  %683 = vrot.lane.b32.xlu1 %v4366_v50, %s4252_s27 }
 0x238   :  { %1029 = vrot.lane.b32.xlu0 %v4380_v51, %s4249_s24  ;;  %1031 = vrot.lane.b32.xlu1 %v4380_v51, %s4247_s22 }
 0x23c   :  { %1194 = vrot.lane.b32.xlu0 %v4380_v51, %s4251_s26  ;;  %1196 = vrot.lane.b32.xlu1 %v4380_v51, %s4248_s23 }
 0x240   :  { %1359 = vrot.lane.b32.xlu0 %v4380_v51, %s4252_s27  ;;  %1361 = vrot.lane.b32.xlu1 %v4380_v51, %s4250_s25 }
 0x29a   :  { %v356_v52 = vpop.permute.xlu0 %355  ;;  %v190_v53 = vpop.permute.xlu1 %189 }
 0x29b   :  { %3766 = vmatpush3.xpose.msk.msra.mxu1 %vm191_vm3, %v190_v53  ;;  %3776 = vmatpush3.xpose.msk.msra.mxu0 %vm191_vm3, %v356_v52 }
 0x29c   :  { %3785 = vmatprep.subr.mxu0 %v4245_v44  ;;  %3770 = vmatprep.subr.mxu1 %v4245_v44 }
 0x29e   :  { %v521_v54 = vpop.permute.xlu0 %520  ;;  %3768 = vmatmul.mubr.msk.f32.vlgmr.msra.gmra.mrb[2].mxu1 %vm191_vm3, %v4366_v50  ;;  %v354_v55 = vpop.permute.xlu1 %353 }
 0x29f   :  { %3778 = vmatmul.mubr.msk.f32.vlgmr.msra.gmra.mrb[0].mxu0 %vm191_vm3, %v354_v55  ;;  %3772 = vmatprep.mubr.msk.f32.mxu1 %vm4246_vm1, %v4245_v44 }
 0x2a0   :  { %3786 = vmatpush3.xpose.msk.msra.mxu0 %vm191_vm3, %v521_v54  ;;  %3787 = vmatprep.mubr.msk.f32.mxu0 %vm4246_vm1, %v4245_v44 }
 0x2a1   :  { %3795 = vmatprep.subr.mxu0 %v4245_v44 }
 0x2a2   :  { %v686_v56 = vpop.permute.xlu0 %685  ;;  %v519_v57 = vpop.permute.xlu1 %518 }
 0x2a3   :  { %3788 = vmatmul.mubr.msk.f32.vlgmr.msra.gmra.mrb[2].mxu0 %vm191_vm3, %v519_v57 }
 0x2a4   :  { %3796 = vmatpush3.xpose.msk.msra.mxu0 %vm191_vm3, %v686_v56  ;;  %3797 = vmatprep.mubr.msk.f32.mxu0 %vm4246_vm1, %v4245_v44 }
 0x2a5   :  { %3805 = vmatprep.subr.mxu0 %v4245_v44 }
 0x2a6   :  { %v867_v58 = vpop.permute.xlu0 %866  ;;  %v684_v59 = vpop.permute.xlu1 %683 }
 0x2a7   :  { %3798 = vmatmul.mubr.msk.f32.vlgmr.msra.gmra.mrb[4].mxu0 %vm191_vm3, %v684_v59 }
 0x2a8   :  { %3806 = vmatpush3.xpose.msk.msra.mxu0 %vm191_vm3, %v867_v58  ;;  %3807 = vmatprep.mubr.msk.f32.mxu0 %vm4246_vm1, %v4245_v44 }
 0x2a9   :  { %3815 = vmatprep.subr.mxu0 %v4245_v44 }
 0x2aa   :  { %v1030_v60 = vpop.permute.xlu0 %1029  ;;  %v1032_v61 = vpop.permute.xlu1 %1031 }
 0x2ab   :  { %3808 = vmatmul.mubr.msk.f32.vlgmr.msra.gmra.mrb[6].mxu0 %vm191_vm3, %v4380_v51 }
 0x2ac   :  { %3816 = vmatpush3.xpose.msk.msra.mxu0 %vm191_vm3, %v1032_v61  ;;  %3817 = vmatprep.mubr.msk.f32.mxu0 %vm4246_vm1, %v4245_v44 }
 0x2ad   :  { %3825 = vmatprep.subr.mxu0 %v4245_v44 }
 0x2ae   :  { %v1197_v62 = vpop.permute.xlu1 %1196  ;;  %v1195_v63 = vpop.permute.xlu0 %1194 }
 0x2af   :  { %3818 = vmatmul.mubr.msk.f32.vlgmr.msra.gmra.mrb[8].mxu0 %vm191_vm3, %v1030_v60 }
 0x2b0   :  { %3826 = vmatpush3.xpose.msk.msra.mxu0 %vm191_vm3, %v1197_v62  ;;  %3827 = vmatprep.mubr.msk.f32.mxu0 %vm4246_vm1, %v4245_v44 }
 0x2b1   :  { %3835 = vmatprep.subr.mxu0 %v4245_v44 }
 0x2b2   :  { %v1362_v2 = vpop.permute.xlu1 %1361  ;;  %v1360_v3 = vpop.permute.xlu0 %1359 }
 0x2b3   :  { %3828 = vmatmul.mubr.msk.f32.vlgmr.msra.gmra.mrb[10].mxu0 %vm191_vm3, %v1195_v63 }
 0x2b4   :  { %3836 = vmatpush3.xpose.msk.msra.mxu0 %vm191_vm3, %v1362_v2  ;;  %3837 = vmatprep.mubr.msk.f32.mxu0 %vm4246_vm1, %v4245_v44 }
 0x2b7   :  { %3838 = vmatmul.mubr.msk.f32.vlgmr.msra.gmra.mrb[12].mxu0 %vm191_vm3, %v1360_v3 }
 0x371   :  { %v262_v7 = vpop.f32.mrb[2].mxu1 }
 0x372   :  { %v263_v8 = vadd.f32 %v262_v7, %v42_v6  ;;  %v3769_v9 = vpop.f32.mrb[3].mxu1  ;;  %v427_v10 = vpop.f32.mrb[0].mxu0 }
 0x373   :  { %v428_v11 = vadd.f32 %v427_v10, %v42_v6  ;;  %v3779_v12 = vpop.f32.mrb[1].mxu0 }
 0x374   :  { %v266_v13 = vsel %vm191_vm3, %v263_v8, -inf }
 0x375   :  { %267 = vmax.xlane.f32.xlu1 %v266_v13  ;;  %v431_v14 = vsel %vm191_vm3, %v428_v11, -inf }
 0x376   :  { %432 = vmax.xlane.f32.xlu0 %v431_v14  ;;  %v592_v18 = vpop.f32.mrb[2].mxu0 }
 0x377   :  { %v593_v21 = vadd.f32 %v592_v18, %v42_v6  ;;  %v3789_v22 = vpop.f32.mrb[3].mxu0 }
 0x379   :  { %v596_v23 = vsel %vm191_vm3, %v593_v21, -inf }
 0x37a   :  { %597 = vmax.xlane.f32.xlu0 %v596_v23  ;;  %v757_v24 = vpop.f32.mrb[4].mxu0 }
 0x37b   :  { %v758_v25 = vadd.f32 %v757_v24, %v42_v6  ;;  %v3799_v26 = vpop.f32.mrb[5].mxu0 }
 0x37d   :  { %v761_v27 = vsel %vm191_vm3, %v758_v25, -inf }
 0x37e   :  { %762 = vmax.xlane.f32.xlu0 %v761_v27  ;;  %v938_v28 = vpop.f32.mrb[6].mxu0 }
 0x37f   :  { %v939_v29 = vadd.f32 %v938_v28, %v42_v6  ;;  %v3809_v30 = vpop.f32.mrb[7].mxu0 }
 0x381   :  { %v942_v31 = vsel %vm191_vm3, %v939_v29, -inf }
 0x382   :  { %943 = vmax.xlane.f32.xlu1 %v942_v31  ;;  %v1103_v32 = vpop.f32.mrb[8].mxu0 }
 0x383   :  { %v1104_v33 = vadd.f32 %v1103_v32, %v42_v6  ;;  %v3819_v34 = vpop.f32.mrb[9].mxu0 }
 0x385   :  { %v1107_v35 = vsel %vm191_vm3, %v1104_v33, -inf }
 0x386   :  { %1108 = vmax.xlane.f32.xlu0 %v1107_v35  ;;  %v1268_v36 = vpop.f32.mrb[10].mxu0 }
 0x387   :  { %v1269_v37 = vadd.f32 %v1268_v36, %v42_v6  ;;  %v3829_v38 = vpop.f32.mrb[11].mxu0 }
 0x389   :  { %v1272_v39 = vsel %vm191_vm3, %v1269_v37, -inf }
 0x38a   :  { %1273 = vmax.xlane.f32.xlu1 %v1272_v39  ;;  %v1433_v40 = vpop.f32.mrb[12].mxu0 }
 0x38b   :  { %v1434_v41 = vadd.f32 %v1433_v40, %v42_v6  ;;  %v3839_v42 = vpop.f32.mrb[13].mxu0 }
 0x38d   :  { %v1437_v43 = vsel %vm191_vm3, %v1434_v41, -inf }
 0x38e   :  { %1438 = vmax.xlane.f32.xlu0 %v1437_v43 }
 0x39b   :  { %442 = vrot.lane.b32.xlu1 %v4366_v50, %s4254_s2 }
 0x39f   :  { %607 = vrot.lane.b32.xlu1 %v4366_v50, %s4255_s30 }
 0x3a4   :  { %277 = vrot.lane.b32.xlu0 %v4366_v50, %s4244_s21 }
 0x402   :  { %v268_v45 = vpop.xlane.xlu1 %267 }
 0x403   :  { %v269_v46 = vsub.f32 %v263_v8, %v268_v45  ;;  %v433_v47 = vpop.xlane.xlu0 %432 }
 0x404   :  { %v434_v48 = vsub.f32 %v428_v11, %v433_v47 }
 0x405   :  { %v270_v49 = vmul.f32 1.442695, %v269_v46 }
 0x406   :  { %v435_v52 = vmul.f32 1.442695, %v434_v48 }
 0x407   :  { %4118 = vpow2.f32 %v270_v49  ;;  %v598_v53 = vpop.xlane.xlu0 %597 }
 0x408   :  { %4120 = vpow2.f32 %v435_v52  ;;  %v599_v62 = vsub.f32 %v593_v21, %v598_v53 }
 0x40a   :  { %v600_v3 = vmul.f32 1.442695, %v599_v62 }
 0x40b   :  { %v763_v57 = vpop.xlane.xlu0 %762 }
 0x40c   :  { %v764_v63 = vsub.f32 %v758_v25, %v763_v57  ;;  %4122 = vpow2.f32 %v600_v3 }
 0x40e   :  { %v765_v5 = vmul.f32 1.442695, %v764_v63  ;;  %v4089_v63 = vpack.i.bf16 %v4351_v20, %v4346_v19 }
 0x40f   :  { %v944_v2 = vpop.xlane.xlu1 %943 }
 0x410   :  { %v945_v4 = vsub.f32 %v939_v29, %v944_v2  ;;  %4124 = vpow2.f32 %v765_v5 }
 0x411   :  { %v4454_v54 = vpop.eup %4118 }
 0x412   :  { %v4456_v55 = vpop.eup %4120  ;;  %v272_v56 = vsel %vm191_vm3, %v4454_v54, 0.0  ;;  %v946_v8 = vmul.f32 1.442695, %v945_v4 }
 0x413   :  { %273 = vadd.xlane.f32.xlu1 %v272_v56  ;;  %v437_v58 = vsel %vm191_vm3, %v4456_v55, 0.0  ;;  %v1109_v59 = vpop.xlane.xlu0 %1108 }
 0x414   :  { %438 = vadd.xlane.f32.xlu0 %v437_v58  ;;  %v1110_v6 = vsub.f32 %v1104_v33, %v1109_v59  ;;  %4126 = vpow2.f32 %v946_v8 }
 0x416   :  { %v1111_v10 = vmul.f32 1.442695, %v1110_v6 }
 0x417   :  { %v1274_v7 = vpop.xlane.xlu1 %1273 }
 0x418   :  { %v1275_v9 = vsub.f32 %v1269_v37, %v1274_v7  ;;  %4128 = vpow2.f32 %v1111_v10 }
 0x41a   :  { %v1276_v11 = vmul.f32 1.442695, %v1275_v9 }
 0x41b   :  { %v1439_v60 = vpop.xlane.xlu0 %1438  ;;  %v443_v30 = vpop.permute.xlu1 %442 }
 0x41c   :  { %v1440_v12 = vsub.f32 %v1434_v41, %v1439_v60  ;;  %4130 = vpow2.f32 %v1276_v11 }
 0x41e   :  { %v1441_v13 = vmul.f32 1.442695, %v1440_v12 }
 0x41f   :  { %v278_v61 = vpop.permute.xlu0 %277  ;;  %v608_v31 = vpop.permute.xlu1 %607 }
 0x420   :  { %3771 = vmatpush3.msra.mxu1 %v278_v61  ;;  %4132 = vpow2.f32 %v1441_v13 }
 0x421   :  { %3780 = vmatprep.subr.mxu1 %v4245_v44 }
 0x424   :  { %953 = vrot.lane.b32.xlu1 %v4380_v51, %s4244_s21 }
 0x42a   :  { %772 = vrot.lane.b32.xlu0 %v4366_v50, %s4256_s7  ;;  %v4123_v50 = vpop.eup %4122 }
 0x42b   :  { %v4125_v14 = vpop.eup %4124  ;;  %v602_v18 = vsel %vm191_vm3, %v4123_v50, 0.0 }
 0x42c   :  { %v4127_v21 = vpop.eup %4126  ;;  %v767_v22 = vsel %vm191_vm3, %v4125_v14, 0.0 }
 0x42d   :  { %v4469_v23 = vpop.eup %4128  ;;  %v948_v24 = vsel %vm191_vm3, %v4127_v21, 0.0 }
 0x42e   :  { %v4472_v25 = vpop.eup %4130  ;;  %v1113_v26 = vsel %vm191_vm3, %v4469_v23, 0.0 }
 0x42f   :  { %v1278_v27 = vsel %vm191_vm3, %v4472_v25, 0.0  ;;  %v4478_v28 = vpop.eup %4132 }
 0x430   :  { %v1443_v29 = vsel %vm191_vm3, %v4478_v28, 0.0 }
 0x448   :  { %603 = vadd.xlane.f32.xlu1 %v602_v18 }
 0x449   :  { %768 = vadd.xlane.f32.xlu0 %v767_v22 }
 0x44c   :  { %949 = vadd.xlane.f32.xlu1 %v948_v24 }
 0x44d   :  { %1114 = vadd.xlane.f32.xlu0 %v1113_v26 }
 0x450   :  { %1279 = vadd.xlane.f32.xlu1 %v1278_v27 }
 0x454   :  { %1444 = vadd.xlane.f32.xlu1 %v1443_v29 }
 0x463   :  { %1118 = vrot.lane.b32.xlu0 %v4380_v51, %s4254_s2 }
 0x465   :  { %1283 = vrot.lane.b32.xlu1 %v4380_v51, %s4255_s30 }
 0x467   :  { %1448 = vrot.lane.b32.xlu0 %v4380_v51, %s4256_s7 }
 0x469   :  { %4085 = vrot.lane.b32.xlu1 %v4084_v17, %s4257_s8 }
 0x46b   :  { %4090 = vrot.lane.b32.xlu0 %v4089_v63, %s4257_s8 }
 0x4a0   :  { %v274_v32 = vpop.xlane.xlu1 %273 }
 0x4a1   :  { %4134 = vrcp.f32 %v274_v32  ;;  %v439_v33 = vpop.xlane.xlu0 %438 }
 0x4a2   :  { %4136 = vrcp.f32 %v439_v33 }
 0x4a4   :  { %v954_v51 = vpop.permute.xlu1 %953 }
 0x4a5   :  { %v773_v38 = vpop.permute.xlu0 %772 }
 0x4ab   :  { %v4135_v34 = vpop.eup %4134 }
 0x4ac   :  { %v276_v35 = vmul.f32 %v4135_v34, %v4454_v54  ;;  %v4137_v36 = vpop.eup %4136 }
 0x4ad   :  { %v441_v37 = vmul.f32 %v4137_v36, %v4456_v55 }
 0x4ae   :  { %3773 = vmatmul.mubr.msk.f32.vlgmr.msra.gmra.mrb[4].mxu1 %vm191_vm3, %v276_v35 }
 0x4af   :  { %3781 = vmatpush3.msra.mxu1 %v443_v30  ;;  %3782 = vmatprep.mubr.msk.f32.mxu1 %vm4246_vm1, %v4245_v44 }
 0x4b0   :  { %3790 = vmatprep.subr.mxu1 %v4245_v44 }
 0x4b2   :  { %3783 = vmatmul.mubr.msk.f32.vlgmr.msra.gmra.mrb[6].mxu1 %vm191_vm3, %v441_v37 }
 0x4b3   :  { %3791 = vmatpush3.msra.mxu1 %v608_v31  ;;  %3792 = vmatprep.mubr.msk.f32.mxu1 %vm4246_vm1, %v4245_v44 }
 0x4b4   :  { %3800 = vmatprep.subr.mxu1 %v4245_v44 }
 0x4d5   :  { %v604_v39 = vpop.xlane.xlu1 %603 }
 0x4d6   :  { %4138 = vrcp.f32 %v604_v39  ;;  %v769_v40 = vpop.xlane.xlu0 %768 }
 0x4d7   :  { %4140 = vrcp.f32 %v769_v40 }
 0x4d9   :  { %v950_v41 = vpop.xlane.xlu1 %949 }
 0x4da   :  { %4142 = vrcp.f32 %v950_v41  ;;  %v1115_v42 = vpop.xlane.xlu0 %1114 }
 0x4db   :  { %4144 = vrcp.f32 %v1115_v42 }
 0x4dd   :  { %v1280_v43 = vpop.xlane.xlu1 %1279 }
 0x4de   :  { %4146 = vrcp.f32 %v1280_v43  ;;  %v1119_v55 = vpop.permute.xlu0 %1118 }
 0x4e0   :  { %v4139_v45 = vpop.eup %4138 }
 0x4e1   :  { %v606_v46 = vmul.f32 %v4139_v45, %v4123_v50  ;;  %v4141_v47 = vpop.eup %4140  ;;  %v1445_v49 = vpop.xlane.xlu1 %1444 }
 0x4e2   :  { %v771_v48 = vmul.f32 %v4141_v47, %v4125_v14  ;;  %4148 = vrcp.f32 %v1445_v49  ;;  %v1449_v61 = vpop.permute.xlu0 %1448  ;;  %v1684_v47 = vld [vmem:[%s4843_s3 + $0x38] sm:$0xff] }
 0x4e3   :  { %3793 = vmatmul.mubr.msk.f32.vlgmr.msra.gmra.mrb[8].mxu1 %vm191_vm3, %v606_v46 }
 0x4e4   :  { %3801 = vmatpush3.msra.mxu1 %v773_v38  ;;  %3802 = vmatprep.mubr.msk.f32.mxu1 %vm4246_vm1, %v4245_v44  ;;  %v4143_v52 = vpop.eup %4142 }
 0x4e5   :  { %3810 = vmatprep.subr.mxu1 %v4245_v44  ;;  %v952_v53 = vmul.f32 %v4143_v52, %v4127_v21  ;;  %v4145_v54 = vpop.eup %4144  ;;  %v1284_v58 = vpop.permute.xlu1 %1283 }
 0x4e6   :  { %v1117_v56 = vmul.f32 %v4145_v54, %v4469_v23  ;;  %v4091_v6 = vpop.permute.xlu0 %4090  ;;  %v3602_v23 = vld [vmem:[#allocation2 + $0x1] ss:$0 sm:$0xff] }
 0x4e7   :  { %3803 = vmatmul.mubr.msk.f32.vlgmr.msra.gmra.mrb[10].mxu1 %vm191_vm3, %v771_v48  ;;  %v4093_v7 = vunpack.i.h.bf16 %v4091_v6  ;;  %v4092_v8 = vunpack.i.l.bf16 %v4091_v6 }
 0x4e8   :  { %3811 = vmatpush3.msra.mxu1 %v954_v51  ;;  %3812 = vmatprep.mubr.msk.f32.mxu1 %vm4246_vm1, %v4245_v44  ;;  %v4147_v57 = vpop.eup %4146 }
 0x4e9   :  { %3820 = vmatprep.subr.mxu1 %v4245_v44  ;;  %v1282_v59 = vmul.f32 %v4147_v57, %v4472_v25  ;;  %v4086_v2 = vpop.permute.xlu1 %4085  ;;  %v4011_v9 = vpack.c.bf16 %v4093_v7, %v4092_v8 }
 0x4ea   :  { %v4088_v3 = vunpack.i.h.bf16 %v4086_v2  ;;  %v4087_v4 = vunpack.i.l.bf16 %v4086_v2  ;;  %v38_v2 = vld [vmem:[%s4841_s1] sm:$0xff] }
 0x4eb   :  { %3813 = vmatmul.mubr.msk.f32.vlgmr.msra.gmra.mrb[12].mxu1 %vm191_vm3, %v952_v53 }
 0x4ec   :  { %3821 = vmatpush3.msra.mxu1 %v1119_v55  ;;  %3822 = vmatprep.mubr.msk.f32.mxu1 %vm4246_vm1, %v4245_v44  ;;  %v4149_v60 = vpop.eup %4148  ;;  %v4007_v5 = vpack.c.bf16 %v4088_v3, %v4087_v4  ;;  %v4584_v4 = vld [vmem:[#allocation2 + $0x2] ss:$0 sm:$0xff] }
 0x4ed   :  { %3830 = vmatprep.subr.mxu1 %v4245_v44  ;;  %v1447_v62 = vmul.f32 %v4149_v60, %v4478_v28  ;;  %v1682_v60 = vld [vmem:[%s4843_s3 + $0x8] sm:$0xff] }
 0x4ee   :  { %4008 = vmatprep.subr.bf16.mxu0 %v4007_v5 }
 0x4ef   :  { %3823 = vmatmul.mubr.msk.f32.vlgmr.msra.gmra.mrb[14].mxu1 %vm191_vm3, %v1117_v56  ;;  %4010 = vmatpush3.bf16.msra.mxu0 %v4007_v5 }
 0x4f0   :  { %3831 = vmatpush3.msra.mxu1 %v1284_v58  ;;  %3832 = vmatprep.mubr.msk.f32.mxu1 %vm4246_vm1, %v4245_v44 }
 0x4f1   :  { %3840 = vmatprep.subr.mxu1 %v4245_v44  ;;  %4012 = vmatprep.subr.bf16.mxu0 %v4011_v9 }
 0x4f3   :  { %3833 = vmatmul.mubr.msk.f32.vlgmr.msra.gmra.mrb[16].mxu1 %vm191_vm3, %v1282_v59  ;;  %4014 = vmatpush3.bf16.msra.mxu0 %v4011_v9 }
 0x4f4   :  { %3841 = vmatpush3.msra.mxu1 %v1449_v61  ;;  %3842 = vmatprep.mubr.msk.f32.mxu1 %vm4246_vm1, %v4245_v44  ;;  %v1683_v61 = vld [vmem:[%s4843_s3 + $0x20] sm:$0xff] }
 0x4f5   :  { %v4015_v63 = vpack.c.bf16 %v1683_v61, %v1682_v60 }
 0x4f7   :  { %3843 = vmatmul.mubr.msk.f32.vlgmr.msra.gmra.mrb[18].mxu1 %vm191_vm3, %v1447_v62  ;;  %v4575_v62 = vpack.i.bf16 %v1683_v61, %v1682_v60  ;;  %4016 = vmatprep.subr.bf16.mxu1 %v4015_v63 }
 0x4f8   :  { %4018 = vmatpush3.bf16.msra.mxu1 %v4015_v63 }
 0x581   :  { %v349_v10 = vpop.f32.mrb[4].mxu1 }
 0x582   :  { %v3774_v15 = vpop.f32.mrb[5].mxu1 }
 0x585   :  { %v514_v16 = vpop.f32.mrb[6].mxu1 }
 0x586   :  { %849 = vrot.lane.b32.xlu1 %v514_v16, %s4258_s9  ;;  %v3784_v17 = vpop.f32.mrb[7].mxu1 }
 0x5b6   :  { %v679_v19 = vpop.f32.mrb[8].mxu1 }
 0x5b7   :  { %853 = vrot.lane.b32.xlu0 %v679_v19, %s4259_s10  ;;  %v3794_v20 = vpop.f32.mrb[9].mxu1 }
 0x5ba   :  { %v844_v11 = vpop.f32.mrb[10].mxu1 }
 0x5bb   :  { %857 = vrot.lane.b32.xlu0 %v844_v11, %s4260_s11  ;;  %v3804_v12 = vpop.f32.mrb[11].mxu1 }
 0x5be   :  { %v1025_v13 = vpop.f32.mrb[12].mxu1 }
 0x5bf   :  { %v3814_v50 = vpop.f32.mrb[13].mxu1 }
 0x5c2   :  { %v1190_v14 = vpop.f32.mrb[14].mxu1 }
 0x5c3   :  { %1525 = vrot.lane.b32.xlu1 %v1190_v14, %s4258_s9  ;;  %v3824_v18 = vpop.f32.mrb[15].mxu1 }
 0x5c6   :  { %v1355_v21 = vpop.f32.mrb[16].mxu1 }
 0x5c7   :  { %1529 = vrot.lane.b32.xlu1 %v1355_v21, %s4259_s10  ;;  %v3834_v22 = vpop.f32.mrb[17].mxu1  ;;  %v39_v21 = vld [vmem:[%s4841_s1 + $0x8] sm:$0xff] }
 0x5ca   :  { %v1520_v24 = vpop.f32.mrb[18].mxu1 }
 0x5cb   :  { %1533 = vrot.lane.b32.xlu0 %v1520_v24, %s4260_s11  ;;  %v3844_v25 = vpop.f32.mrb[19].mxu1  ;;  %1560 = vrot.lane.b32.xlu1 %v3602_v23, %s4243_s5 }
 0x5f8   :  { %v850_v26 = vpop.permute.xlu1 %849 }
 0x5f9   :  { %v860_v28 = vsel %vm191_vm3, %v349_v10, %v850_v26 }
 0x629   :  { %v854_v27 = vpop.permute.xlu0 %853 }
 0x62a   :  { %v862_v29 = vsel %vm861_vm5, %v860_v28, %v854_v27 }
 0x62d   :  { %v858_v30 = vpop.permute.xlu0 %857 }
 0x62e   :  { %v864_v31 = vsel %vm863_vm6, %v862_v29, %v858_v30 }
 0x62f   :  { %3853 = vmatprep.mubr.msk.f32.mxu0 %vm44_vm0, %v864_v31 }
 0x635   :  { %v1526_v32 = vpop.permute.xlu1 %1525 }
 0x636   :  { %v1536_v34 = vsel %vm191_vm3, %v1025_v13, %v1526_v32 }
 0x639   :  { %v1530_v33 = vpop.permute.xlu1 %1529 }
 0x63a   :  { %v1537_v35 = vsel %vm861_vm5, %v1536_v34, %v1530_v33 }
 0x63d   :  { %v1534_v36 = vpop.permute.xlu0 %1533  ;;  %v1561_v51 = vpop.permute.xlu1 %1560 }
 0x63e   :  { %v1538_v37 = vsel %vm863_vm6, %v1537_v35, %v1534_v36 }
 0x63f   :  { %3854 = vmatmul.mubr.msk.f32.vlgmr.msra.gmra.mrb[14].mxu0 %vm44_vm0, %v1538_v37 }
 0x640   :  { %3875 = vmatprep.mubr.msk.f32.mxu0 %vm44_vm0, %v38_v2 }
 0x712   :  { %v3855_v38 = vpop.f32.mrb[14].mxu0 }
 0x713   :  { %v1641_v39 = vadd.f32 %v3855_v38, %v1561_v51  ;;  %v1635_v40 = vpop.f32.mrb[15].mxu0 }
 0x714   :  { %v1636_v41 = vadd.f32 %v1635_v40, %v1561_v51 }
 0x715   :  { %v4544_v42 = vadd.f32 %v1641_v39, %v4318_v1  ;;  %v1685_v1 = vld [vmem:[%s4843_s3 + $0x50] sm:$0xff] }
 0x716   :  { %v4547_v43 = vadd.f32 %v1636_v41, %v4313_v0  ;;  %v4559_v48 = vpack.i.bf16 %v1685_v1, %v1684_v47  ;;  %v4019_v3 = vpack.c.bf16 %v1685_v1, %v1684_v47 }
 0x717   :  { %v1649_v45 = vsel %vm44_vm0, %v4544_v42, 0.0 }
 0x718   :  { %1650 = vadd.xlane.f32.xlu1 %v1649_v45  ;;  %v1646_v46 = vsel %vm44_vm0, %v4547_v43, 0.0  ;;  %4020 = vmatprep.subr.bf16.mxu1 %v4019_v3 }
 0x719   :  { %1647 = vadd.xlane.f32.xlu0 %v1646_v46  ;;  %4022 = vmatpush3.bf16.msra.mxu1 %v4019_v3 }
 0x71a   :  { %3878 = vmatprep.subr.mxu1 %v4245_v44 }
 0x729   :  { %4100 = vrot.lane.b32.xlu1 %v4559_v48, %s4243_s5 }
 0x72d   :  { %1672 = vrot.lane.b32.xlu1 %v3602_v23, %s4244_s21 }
 0x731   :  { %1677 = vrot.lane.b32.xlu1 %v3602_v23, %s4257_s8 }
 0x7a5   :  { %v1651_v0 = vpop.xlane.xlu1 %1650 }
 0x7a6   :  { %v1653_v49 = vmul.f32 0.03125, %v1651_v0  ;;  %v1648_v52 = vpop.xlane.xlu0 %1647 }
 0x7a7   :  { %v1652_v53 = vmul.f32 0.03125, %v1648_v52 }
 0x7a8   :  { %v1655_v54 = vsub.f32 %v4544_v42, %v1653_v49 }
 0x7a9   :  { %v1654_v55 = vsub.f32 %v4547_v43, %v1652_v53  ;;  %v4101_v9 = vpop.permute.xlu1 %4100 }
 0x7aa   :  { %v1657_v56 = vmul.f32 %v1655_v54, %v1655_v54  ;;  %v4103_v16 = vunpack.i.h.bf16 %v4101_v9  ;;  %v4102_v17 = vunpack.i.l.bf16 %v4101_v9 }
 0x7ab   :  { %v1656_v58 = vmul.f32 %v1654_v55, %v1654_v55 }
 0x7ac   :  { %v1661_v57 = vsel %vm44_vm0, %v1657_v56, 0.0  ;;  %v4027_v13 = vpack.c.bf16 %v4103_v16, %v4102_v17 }
 0x7ad   :  { %1662 = vadd.xlane.f32.xlu0 %v1661_v57  ;;  %v1658_v59 = vsel %vm44_vm0, %v1656_v58, 0.0  ;;  %v1673_v14 = vpop.permute.xlu1 %1672 }
 0x7b1   :  { %1659 = vadd.xlane.f32.xlu0 %v1658_v59  ;;  %v1678_v26 = vpop.permute.xlu1 %1677 }
 0x7c7   :  { %4095 = vrot.lane.b32.xlu0 %v4575_v62, %s4243_s5 }
 0x7cb   :  { %1790 = vrot.lane.b32.xlu0 %v4584_v4, %s4243_s5 }
 0x83a   :  { %v1663_v5 = vpop.xlane.xlu0 %1662 }
 0x83b   :  { %v1665_v6 = vmul.f32 0.03125, %v1663_v5 }
 0x83d   :  { %v1667_v7 = vadd.f32 1e-05, %v1665_v6 }
 0x83e   :  { %v1660_v8 = vpop.xlane.xlu0 %1659 }
 0x83f   :  { %4150 = vrsqrt.f32 %v1667_v7  ;;  %v1664_v10 = vmul.f32 0.03125, %v1660_v8 }
 0x841   :  { %v1666_v15 = vadd.f32 1e-05, %v1664_v10 }
 0x842   :  { %v4096_v19 = vpop.permute.xlu0 %4095 }
 0x843   :  { %4152 = vrsqrt.f32 %v1666_v15  ;;  %v4098_v20 = vunpack.i.h.bf16 %v4096_v19  ;;  %v4097_v11 = vunpack.i.l.bf16 %v4096_v19 }
 0x845   :  { %v4023_v12 = vpack.c.bf16 %v4098_v20, %v4097_v11 }
 0x846   :  { %v1791_v29 = vpop.permute.xlu0 %1790 }
 0x847   :  { %4024 = vmatprep.subr.bf16.mxu0 %v4023_v12 }
 0x848   :  { %4026 = vmatpush3.bf16.msra.mxu0 %v4023_v12 }
 0x849   :  { %v4151_v50 = vpop.eup %4150  ;;  %4028 = vmatprep.subr.bf16.mxu0 %v4027_v13 }
 0x84a   :  { %v1671_v18 = vmul.f32 %v4151_v50, %v1655_v54 }
 0x84c   :  { %4030 = vmatpush3.bf16.msra.mxu0 %v4027_v13  ;;  %v1676_v24 = vmul.f32 %v1673_v14, %v1671_v18 }
 0x84d   :  { %v4153_v22 = vpop.eup %4152  ;;  %3888 = vmatprep.subr.mxu0 %v4245_v44 }
 0x84e   :  { %v1670_v23 = vmul.f32 %v4153_v22, %v1654_v55  ;;  %v1681_v28 = vadd.f32 %v1678_v26, %v1676_v24 }
 0x84f   :  { %3876 = vmatmul.mubr.msk.f32.vlgmr.msra.gmra.mrb[16].mxu0 %vm44_vm0, %v39_v21 }
 0x850   :  { %v1675_v25 = vmul.f32 %v1673_v14, %v1670_v23  ;;  %3890 = vmatprep.mubr.msk.f32.mxu0 %vm4246_vm1, %v4245_v44 }
 0x852   :  { %v1680_v27 = vadd.f32 %v1678_v26, %v1675_v25 }
 0x854   :  { %3864 = vmatprep.mubr.msk.f32.mxu1 %vm44_vm0, %v1680_v27 }
 0x855   :  { %3865 = vmatmul.mubr.msk.f32.vlgmr.msra.gmra.mrb[20].mxu1 %vm44_vm0, %v1681_v28 }
 0x856   :  { %3880 = vmatprep.mubr.msk.f32.mxu1 %vm4246_vm1, %v4245_v44 }
 0x922   :  { %v3877_v30 = vpop.f32.mrb[16].mxu0 }
 0x923   :  { %v1865_v31 = vpop.f32.mrb[17].mxu0  ;;  %v4615_v36 = vadd.f32 %v3877_v30, %v1791_v29 }
 0x924   :  { %v4599_v32 = vadd.f32 %v1865_v31, %v1791_v29 }
 0x926   :  { %2039 = vrot.lane.b32.xlu1 %v4599_v32, %s4249_s24  ;;  %3879 = vmatpush3.xpose.msk.msra.mxu1 %vm191_vm3, %v4599_v32 }
 0x927   :  { %3883 = vmatprep.subr.mxu1 %v4245_v44 }
 0x928   :  { %v3866_v33 = vpop.f32.mrb[20].mxu1 }
 0x929   :  { %v1765_v34 = vpop.f32.mrb[21].mxu1  ;;  %v1771_v37 = vadd.f32 %v3866_v33, %v4584_v4 }
 0x92a   :  { %v1766_v35 = vadd.f32 %v4584_v4, %v1765_v34  ;;  %2204 = vrot.lane.b32.xlu1 %v4599_v32, %s4251_s26 }
 0x92c   :  { %2037 = vrot.lane.b32.xlu0 %v1766_v35, %s4249_s24  ;;  %3881 = vmatmul.mubr.msk.f32.vlgmr.msra.gmra.mrb[22].mxu1 %vm191_vm3, %v1766_v35 }
 0x92d   :  { %3885 = vmatprep.mubr.msk.f32.mxu1 %vm4246_vm1, %v4245_v44 }
 0x92e   :  { %2369 = vrot.lane.b32.xlu1 %v4599_v32, %s4252_s27 }
 0x930   :  { %2202 = vrot.lane.b32.xlu0 %v1766_v35, %s4251_s26 }
 0x932   :  { %2712 = vrot.lane.b32.xlu1 %v4615_v36, %s4249_s24 }
 0x934   :  { %2367 = vrot.lane.b32.xlu0 %v1766_v35, %s4252_s27 }
 0x936   :  { %2877 = vrot.lane.b32.xlu1 %v4615_v36, %s4251_s26 }
 0x938   :  { %2710 = vrot.lane.b32.xlu0 %v1771_v37, %s4249_s24 }
 0x93a   :  { %3042 = vrot.lane.b32.xlu1 %v4615_v36, %s4252_s27 }
 0x93c   :  { %2875 = vrot.lane.b32.xlu0 %v1771_v37, %s4251_s26 }
 0x940   :  { %3040 = vrot.lane.b32.xlu0 %v1771_v37, %s4252_s27 }
 0x998   :  { %v2040_v51 = vpop.permute.xlu1 %2039 }
 0x999   :  { %3889 = vmatpush3.xpose.msk.msra.mxu0 %vm191_vm3, %v2040_v51 }
 0x99a   :  { %3898 = vmatprep.subr.mxu0 %v4245_v44 }
 0x99c   :  { %v2205_v38 = vpop.permute.xlu1 %2204 }
 0x99e   :  { %v2038_v39 = vpop.permute.xlu0 %2037 }
 0x99f   :  { %3891 = vmatmul.mubr.msk.f32.vlgmr.msra.gmra.mrb[18].mxu0 %vm191_vm3, %v2038_v39 }
 0x9a0   :  { %3899 = vmatpush3.xpose.msk.msra.mxu0 %vm191_vm3, %v2205_v38  ;;  %3900 = vmatprep.mubr.msk.f32.mxu0 %vm4246_vm1, %v4245_v44  ;;  %v2370_v40 = vpop.permute.xlu1 %2369 }
 0x9a1   :  { %3908 = vmatprep.subr.mxu0 %v4245_v44 }
 0x9a2   :  { %v2203_v41 = vpop.permute.xlu0 %2202 }
 0x9a3   :  { %3901 = vmatmul.mubr.msk.f32.vlgmr.msra.gmra.mrb[20].mxu0 %vm191_vm3, %v2203_v41 }
 0x9a4   :  { %3909 = vmatpush3.xpose.msk.msra.mxu0 %vm191_vm3, %v2370_v40  ;;  %3910 = vmatprep.mubr.msk.f32.mxu0 %vm4246_vm1, %v4245_v44  ;;  %v2713_v46 = vpop.permute.xlu1 %2712 }
 0x9a5   :  { %3918 = vmatprep.subr.mxu0 %v4245_v44 }
 0x9a6   :  { %v2368_v45 = vpop.permute.xlu0 %2367 }
 0x9a7   :  { %3911 = vmatmul.mubr.msk.f32.vlgmr.msra.gmra.mrb[22].mxu0 %vm191_vm3, %v2368_v45 }
 0x9a8   :  { %3919 = vmatpush3.xpose.msk.msra.mxu0 %vm191_vm3, %v4615_v36  ;;  %3920 = vmatprep.mubr.msk.f32.mxu0 %vm4246_vm1, %v4245_v44  ;;  %v2878_v1 = vpop.permute.xlu1 %2877 }
 0x9a9   :  { %3928 = vmatprep.subr.mxu0 %v4245_v44 }
 0x9aa   :  { %v2711_v47 = vpop.permute.xlu0 %2710 }
 0x9ab   :  { %3921 = vmatmul.mubr.msk.f32.vlgmr.msra.gmra.mrb[24].mxu0 %vm191_vm3, %v1771_v37 }
 0x9ac   :  { %3929 = vmatpush3.xpose.msk.msra.mxu0 %vm191_vm3, %v2713_v46  ;;  %3930 = vmatprep.mubr.msk.f32.mxu0 %vm4246_vm1, %v4245_v44  ;;  %v3043_v49 = vpop.permute.xlu1 %3042 }
 0x9ad   :  { %3938 = vmatprep.subr.mxu0 %v4245_v44 }
 0x9ae   :  { %v2876_v0 = vpop.permute.xlu0 %2875 }
 0x9af   :  { %3931 = vmatmul.mubr.msk.f32.vlgmr.msra.gmra.mrb[26].mxu0 %vm191_vm3, %v2711_v47 }
 0x9b0   :  { %3939 = vmatpush3.xpose.msk.msra.mxu0 %vm191_vm3, %v2878_v1  ;;  %3940 = vmatprep.mubr.msk.f32.mxu0 %vm4246_vm1, %v4245_v44 }
 0x9b1   :  { %3948 = vmatprep.subr.mxu0 %v4245_v44 }
 0x9b2   :  { %v3041_v52 = vpop.permute.xlu0 %3040 }
 0x9b3   :  { %3941 = vmatmul.mubr.msk.f32.vlgmr.msra.gmra.mrb[28].mxu0 %vm191_vm3, %v2876_v0 }
 0x9b4   :  { %3949 = vmatpush3.xpose.msk.msra.mxu0 %vm191_vm3, %v3043_v49  ;;  %3950 = vmatprep.mubr.msk.f32.mxu0 %vm4246_vm1, %v4245_v44 }
 0x9b7   :  { %3951 = vmatmul.mubr.msk.f32.vlgmr.msra.gmra.mrb[30].mxu0 %vm191_vm3, %v3041_v52 }
 0x9ff   :  { %v1946_v53 = vpop.f32.mrb[22].mxu1 }
 0xa00   :  { %v3882_v54 = vpop.f32.mrb[23].mxu1  ;;  %v1950_v55 = vsel %vm191_vm3, %v1946_v53, -inf }
 0xa01   :  { %1951 = vmax.xlane.f32.xlu1 %v1950_v55 }
 0xa72   :  { %v2111_v56 = vpop.f32.mrb[18].mxu0 }
 0xa73   :  { %v3892_v57 = vpop.f32.mrb[19].mxu0  ;;  %v2115_v58 = vsel %vm191_vm3, %v2111_v56, -inf }
 0xa74   :  { %2116 = vmax.xlane.f32.xlu0 %v2115_v58 }
 0xa76   :  { %v2276_v59 = vpop.f32.mrb[20].mxu0 }
 0xa77   :  { %v3902_v60 = vpop.f32.mrb[21].mxu0  ;;  %v2280_v61 = vsel %vm191_vm3, %v2276_v59, -inf }
 0xa78   :  { %2281 = vmax.xlane.f32.xlu0 %v2280_v61 }
 0xa7a   :  { %v4665_v63 = vpop.f32.mrb[22].mxu0 }
 0xa7b   :  { %v3912_v2 = vpop.f32.mrb[23].mxu0  ;;  %v2445_v3 = vsel %vm191_vm3, %v4665_v63, -inf }
 0xa7c   :  { %2446 = vmax.xlane.f32.xlu0 %v2445_v3 }
 0xa7e   :  { %v2619_v5 = vpop.f32.mrb[24].mxu0 }
 0xa7f   :  { %v3922_v6 = vpop.f32.mrb[25].mxu0  ;;  %v2623_v7 = vsel %vm191_vm3, %v2619_v5, -inf }
 0xa80   :  { %2624 = vmax.xlane.f32.xlu1 %v2623_v7 }
 0xa82   :  { %v4670_v8 = vpop.f32.mrb[26].mxu0 }
 0xa83   :  { %v3932_v9 = vpop.f32.mrb[27].mxu0  ;;  %v2788_v10 = vsel %vm191_vm3, %v4670_v8, -inf }
 0xa84   :  { %2789 = vmax.xlane.f32.xlu0 %v2788_v10 }
 0xa86   :  { %v2949_v15 = vpop.f32.mrb[28].mxu0 }
 0xa87   :  { %v3942_v16 = vpop.f32.mrb[29].mxu0  ;;  %v2953_v17 = vsel %vm191_vm3, %v2949_v15, -inf }
 0xa88   :  { %2954 = vmax.xlane.f32.xlu1 %v2953_v17 }
 0xa8a   :  { %v3114_v19 = vpop.f32.mrb[30].mxu0 }
 0xa8b   :  { %v3952_v20 = vpop.f32.mrb[31].mxu0  ;;  %v3118_v11 = vsel %vm191_vm3, %v3114_v19, -inf }
 0xa8c   :  { %3119 = vmax.xlane.f32.xlu0 %v3118_v11 }
 0xa8e   :  { %v1952_v12 = vpop.xlane.xlu1 %1951 }
 0xa8f   :  { %v1953_v13 = vsub.f32 %v1946_v53, %v1952_v12 }
 0xa91   :  { %v1954_v50 = vmul.f32 1.442695, %v1953_v13 }
 0xa93   :  { %4154 = vpow2.f32 %v1954_v50 }
 0xa99   :  { %2126 = vrot.lane.b32.xlu1 %v4599_v32, %s4247_s22 }
 0xa9d   :  { %2291 = vrot.lane.b32.xlu1 %v4599_v32, %s4248_s23  ;;  %v4682_v14 = vpop.eup %4154 }
 0xa9e   :  { %v1956_v18 = vsel %vm191_vm3, %v4682_v14, 0.0 }
 0xaa2   :  { %1961 = vrot.lane.b32.xlu0 %v4599_v32, %s4243_s5 }
 0xac1   :  { %1957 = vadd.xlane.f32.xlu1 %v1956_v18 }
 0xad2   :  { %2634 = vrot.lane.b32.xlu1 %v4615_v36, %s4243_s5 }
 0xb01   :  { %v2117_v21 = vpop.xlane.xlu0 %2116 }
 0xb02   :  { %v2118_v22 = vsub.f32 %v2111_v56, %v2117_v21 }
 0xb04   :  { %v2119_v23 = vmul.f32 1.442695, %v2118_v22 }
 0xb05   :  { %v2282_v24 = vpop.xlane.xlu0 %2281 }
 0xb06   :  { %4156 = vpow2.f32 %v2119_v23  ;;  %v2283_v25 = vsub.f32 %v2276_v59, %v2282_v24 }
 0xb08   :  { %v2284_v26 = vmul.f32 1.442695, %v2283_v25 }
 0xb09   :  { %v2447_v31 = vpop.xlane.xlu0 %2446 }
 0xb0a   :  { %4158 = vpow2.f32 %v2284_v26  ;;  %v2448_v54 = vsub.f32 %v4665_v63, %v2447_v31 }
 0xb0c   :  { %v2449_v55 = vmul.f32 1.442695, %v2448_v54 }
 0xb0d   :  { %v2625_v27 = vpop.xlane.xlu1 %2624 }
 0xb0e   :  { %v2626_v28 = vsub.f32 %v2619_v5, %v2625_v27 }
 0xb10   :  { %v4157_v29 = vpop.eup %4156  ;;  %v2627_v30 = vmul.f32 1.442695, %v2626_v28 }
 0xb11   :  { %v2121_v33 = vsel %vm191_vm3, %v4157_v29, 0.0  ;;  %v2790_v35 = vpop.xlane.xlu0 %2789 }
 0xb12   :  { %4160 = vpow2.f32 %v2627_v30  ;;  %2122 = vadd.xlane.f32.xlu0 %v2121_v33  ;;  %v2791_v56 = vsub.f32 %v4670_v8, %v2790_v35 }
 0xb14   :  { %v4159_v34 = vpop.eup %4158  ;;  %v2792_v57 = vmul.f32 1.442695, %v2791_v56 }
 0xb15   :  { %v2955_v37 = vpop.xlane.xlu1 %2954  ;;  %v2286_v51 = vsel %vm191_vm3, %v4159_v34, 0.0 }
 0xb16   :  { %v2956_v38 = vsub.f32 %v2949_v15, %v2955_v37  ;;  %2287 = vadd.xlane.f32.xlu1 %v2286_v51 }
 0xb18   :  { %v2957_v39 = vmul.f32 1.442695, %v2956_v38 }
 0xb19   :  { %v3120_v40 = vpop.xlane.xlu0 %3119  ;;  %v2127_v59 = vpop.permute.xlu1 %2126 }
 0xb1a   :  { %4162 = vpow2.f32 %v2957_v39  ;;  %v3121_v41 = vsub.f32 %v3114_v19, %v3120_v40 }
 0xb1c   :  { %v4690_v45 = vpop.eup %4160  ;;  %v3122_v46 = vmul.f32 1.442695, %v3121_v41 }
 0xb1d   :  { %v1962_v47 = vpop.permute.xlu0 %1961  ;;  %v2629_v1 = vsel %vm191_vm3, %v4690_v45, 0.0  ;;  %v2292_v61 = vpop.permute.xlu1 %2291 }
 0xb1e   :  { %4164 = vpow2.f32 %v3122_v46  ;;  %3884 = vmatpush3.msra.mxu1 %v1962_v47  ;;  %2630 = vadd.xlane.f32.xlu1 %v2629_v1 }
 0xb1f   :  { %3893 = vmatprep.subr.mxu1 %v4245_v44  ;;  %4166 = vpow2.f32 %v2449_v55 }
 0xb20   :  { %4168 = vpow2.f32 %v2792_v57 }
 0xb24   :  { %v4695_v0 = vpop.eup %4162 }
 0xb25   :  { %v2959_v49 = vsel %vm191_vm3, %v4695_v0, 0.0 }
 0xb26   :  { %2960 = vadd.xlane.f32.xlu1 %v2959_v49 }
 0xb28   :  { %v4699_v52 = vpop.eup %4164  ;;  %2456 = vrot.lane.b32.xlu0 %v4599_v32, %s4250_s25 }
 0xb29   :  { %v3124_v53 = vsel %vm191_vm3, %v4699_v52, 0.0  ;;  %v4167_v58 = vpop.eup %4166 }
 0xb2a   :  { %3125 = vadd.xlane.f32.xlu1 %v3124_v53  ;;  %v2451_v60 = vsel %vm191_vm3, %v4167_v58, 0.0  ;;  %v4169_v32 = vpop.eup %4168 }
 0xb2b   :  { %v2794_v2 = vsel %vm191_vm3, %v4169_v32, 0.0 }
 0xb3b   :  { %2964 = vrot.lane.b32.xlu1 %v4615_v36, %s4248_s23 }
 0xb3f   :  { %4105 = vrot.lane.b32.xlu1 %v4575_v62, %s4257_s8 }
 0xb47   :  { %2452 = vadd.xlane.f32.xlu0 %v2451_v60 }
 0xb4b   :  { %2795 = vadd.xlane.f32.xlu0 %v2794_v2 }
 0xb4e   :  { %v1958_v63 = vpop.xlane.xlu1 %1957 }
 0xb4f   :  { %4170 = vrcp.f32 %v1958_v63 }
 0xb52   :  { %v2635_v6 = vpop.permute.xlu1 %2634 }
 0xb59   :  { %v4171_v3 = vpop.eup %4170 }
 0xb5a   :  { %v1960_v5 = vmul.f32 %v4171_v3, %v4682_v14 }
 0xb5c   :  { %3886 = vmatmul.mubr.msk.f32.vlgmr.msra.gmra.mrb[24].mxu1 %vm191_vm3, %v1960_v5 }
 0xb5d   :  { %3894 = vmatpush3.msra.mxu1 %v2127_v59  ;;  %3895 = vmatprep.mubr.msk.f32.mxu1 %vm4246_vm1, %v4245_v44 }
 0xb5e   :  { %3903 = vmatprep.subr.mxu1 %v4245_v44 }
 0xb61   :  { %2799 = vrot.lane.b32.xlu0 %v4615_v36, %s4247_s22 }
 0xb65   :  { %3129 = vrot.lane.b32.xlu0 %v4615_v36, %s4250_s25 }
 0xb69   :  { %4110 = vrot.lane.b32.xlu0 %v4559_v48, %s4257_s8 }
 0xb9f   :  { %v2123_v7 = vpop.xlane.xlu0 %2122 }
 0xba0   :  { %4172 = vrcp.f32 %v2123_v7 }
 0xba3   :  { %v2288_v8 = vpop.xlane.xlu1 %2287  ;;  %v2457_v17 = vpop.permute.xlu0 %2456 }
 0xba4   :  { %4174 = vrcp.f32 %v2288_v8 }
 0xbaa   :  { %v4173_v9 = vpop.eup %4172 }
 0xbab   :  { %v2125_v10 = vmul.f32 %v4173_v9, %v4157_v29  ;;  %v2631_v36 = vpop.xlane.xlu1 %2630 }
 0xbad   :  { %3896 = vmatmul.mubr.msk.f32.vlgmr.msra.gmra.mrb[26].mxu1 %vm191_vm3, %v2125_v10 }
 0xbae   :  { %v4175_v15 = vpop.eup %4174  ;;  %3904 = vmatpush3.msra.mxu1 %v2292_v61  ;;  %3905 = vmatprep.mubr.msk.f32.mxu1 %vm4246_vm1, %v4245_v44 }
 0xbaf   :  { %v2290_v16 = vmul.f32 %v4175_v15, %v4159_v34  ;;  %3913 = vmatprep.subr.mxu1 %v4245_v44 }
 0xbb1   :  { %3906 = vmatmul.mubr.msk.f32.vlgmr.msra.gmra.mrb[28].mxu1 %vm191_vm3, %v2290_v16 }
 0xbb2   :  { %3914 = vmatpush3.msra.mxu1 %v2457_v17  ;;  %3915 = vmatprep.mubr.msk.f32.mxu1 %vm4246_vm1, %v4245_v44 }
 0xbb3   :  { %3923 = vmatprep.subr.mxu1 %v4245_v44  ;;  %v2961_v11 = vpop.xlane.xlu1 %2960 }
 0xbb7   :  { %v3126_v13 = vpop.xlane.xlu1 %3125 }
 0xbbb   :  { %v2965_v24 = vpop.permute.xlu1 %2964 }
 0xbbf   :  { %v4106_v31 = vpop.permute.xlu1 %4105 }
 0xbc0   :  { %v4108_v33 = vunpack.i.h.bf16 %v4106_v31  ;;  %v4107_v34 = vunpack.i.l.bf16 %v4106_v31 }
 0xbc2   :  { %v4031_v35 = vpack.c.bf16 %v4108_v33, %v4107_v34 }
 0xbc4   :  { %4032 = vmatprep.subr.bf16.mxu0 %v4031_v35 }
 0xbc5   :  { %4034 = vmatpush3.bf16.msra.mxu0 %v4031_v35 }
 0xbd4   :  { %v2453_v19 = vpop.xlane.xlu0 %2452 }
 0xbd5   :  { %4176 = vrcp.f32 %v2453_v19  ;;  %v3636_v19 = vld [vmem:[#allocation2 + $0x3] ss:$0 sm:$0xff] }
 0xbd6   :  { %4178 = vrcp.f32 %v2631_v36 }
 0xbd8   :  { %v2796_v20 = vpop.xlane.xlu0 %2795 }
 0xbd9   :  { %4180 = vrcp.f32 %v2796_v20 }
 0xbda   :  { %4182 = vrcp.f32 %v2961_v11 }
 0xbdb   :  { %4184 = vrcp.f32 %v3126_v13 }
 0xbdc   :  { %v2800_v21 = vpop.permute.xlu0 %2799 }
 0xbdf   :  { %v4177_v12 = vpop.eup %4176 }
 0xbe0   :  { %v2455_v50 = vmul.f32 %v4177_v12, %v4167_v58  ;;  %v4179_v14 = vpop.eup %4178  ;;  %v3130_v27 = vpop.permute.xlu0 %3129 }
 0xbe1   :  { %v2633_v62 = vmul.f32 %v4179_v14, %v4690_v45 }
 0xbe2   :  { %3916 = vmatmul.mubr.msk.f32.vlgmr.msra.gmra.mrb[30].mxu1 %vm191_vm3, %v2455_v50 }
 0xbe3   :  { %3924 = vmatpush3.msra.mxu1 %v2635_v6  ;;  %3925 = vmatprep.mubr.msk.f32.mxu1 %vm4246_vm1, %v4245_v44  ;;  %v4181_v18 = vpop.eup %4180 }
 0xbe4   :  { %3933 = vmatprep.subr.mxu1 %v4245_v44  ;;  %v2798_v22 = vmul.f32 %v4181_v18, %v4169_v32  ;;  %v4183_v23 = vpop.eup %4182  ;;  %v4111_v37 = vpop.permute.xlu0 %4110 }
 0xbe5   :  { %v2963_v25 = vmul.f32 %v4183_v23, %v4695_v0  ;;  %v4185_v26 = vpop.eup %4184  ;;  %v4113_v51 = vunpack.i.h.bf16 %v4111_v37  ;;  %v4112_v38 = vunpack.i.l.bf16 %v4111_v37 }
 0xbe6   :  { %3926 = vmatmul.mubr.msk.f32.vlgmr.msra.gmra.mrb[32].mxu1 %vm191_vm3, %v2633_v62  ;;  %v3128_v28 = vmul.f32 %v4185_v26, %v4699_v52 }
 0xbe7   :  { %3934 = vmatpush3.msra.mxu1 %v2800_v21  ;;  %3935 = vmatprep.mubr.msk.f32.mxu1 %vm4246_vm1, %v4245_v44  ;;  %v4035_v39 = vpack.c.bf16 %v4113_v51, %v4112_v38  ;;  %v3358_v21 = vld [vmem:[%s4843_s3 + $0x10] sm:$0xff] }
 0xbe8   :  { %3943 = vmatprep.subr.mxu1 %v4245_v44 }
 0xbe9   :  { %4036 = vmatprep.subr.bf16.mxu0 %v4035_v39 }
 0xbea   :  { %3936 = vmatmul.mubr.msk.f32.vlgmr.msra.gmra.mrb[34].mxu1 %vm191_vm3, %v2798_v22  ;;  %4038 = vmatpush3.bf16.msra.mxu0 %v4035_v39  ;;  %v3359_v22 = vld [vmem:[%s4843_s3 + $0x28] sm:$0xff] }
 0xbeb   :  { %3944 = vmatpush3.msra.mxu1 %v2965_v24  ;;  %3945 = vmatprep.mubr.msk.f32.mxu1 %vm4246_vm1, %v4245_v44  ;;  %v4039_v23 = vpack.c.bf16 %v3359_v22, %v3358_v21  ;;  %v3360_v24 = vld [vmem:[%s4843_s3 + $0x40] sm:$0xff] }
 0xbec   :  { %3953 = vmatprep.subr.mxu1 %v4245_v44 }
 0xbee   :  { %3946 = vmatmul.mubr.msk.f32.vlgmr.msra.gmra.mrb[36].mxu1 %vm191_vm3, %v2963_v25  ;;  %v3361_v25 = vld [vmem:[%s4843_s3 + $0x58] sm:$0xff] }
 0xbef   :  { %3954 = vmatpush3.msra.mxu1 %v3130_v27  ;;  %3955 = vmatprep.mubr.msk.f32.mxu1 %vm4246_vm1, %v4245_v44  ;;  %v4043_v26 = vpack.c.bf16 %v3361_v25, %v3360_v24 }
 0xbf0   :  { %4040 = vmatprep.subr.bf16.mxu1 %v4039_v23 }
 0xbf2   :  { %3956 = vmatmul.mubr.msk.f32.vlgmr.msra.gmra.mrb[38].mxu1 %vm191_vm3, %v3128_v28 }
 0xbf3   :  { %4042 = vmatpush3.bf16.msra.mxu1 %v4039_v23 }
 0xbf4   :  { %4044 = vmatprep.subr.bf16.mxu1 %v4043_v26 }
 0xbf7   :  { %4046 = vmatpush3.bf16.msra.mxu1 %v4043_v26 }
 0xc2f   :  { %v2033_v29 = vpop.f32.mrb[24].mxu1 }
 0xc30   :  { %v3887_v30 = vpop.f32.mrb[25].mxu1 }
 0xc80   :  { %v2198_v44 = vpop.f32.mrb[26].mxu1 }
 0xc81   :  { %2533 = vrot.lane.b32.xlu1 %v2198_v44, %s4258_s9  ;;  %v3897_v40 = vpop.f32.mrb[27].mxu1 }
 0xc84   :  { %v2363_v41 = vpop.f32.mrb[28].mxu1 }
 0xc85   :  { %2537 = vrot.lane.b32.xlu0 %v2363_v41, %s4259_s10  ;;  %v3907_v48 = vpop.f32.mrb[29].mxu1 }
 0xc86   :  { %v3458_v48 = vld [vmem:[%s4844_s4] sm:$0xff] }
 0xcb5   :  { %v2528_v45 = vpop.f32.mrb[30].mxu1 }
 0xcb6   :  { %2541 = vrot.lane.b32.xlu0 %v2528_v45, %s4260_s11  ;;  %v3917_v46 = vpop.f32.mrb[31].mxu1  ;;  %v3459_v45 = vld [vmem:[%s4844_s4 + $0x8] sm:$0xff] }
 0xcb7   :  { %v4047_v46 = vpack.c.bf16 %v3459_v45, %v3458_v48 }
 0xcb9   :  { %v2706_v47 = vpop.f32.mrb[32].mxu1  ;;  %4048 = vmatprep.subr.bf16.mxu0 %v4047_v46 }
 0xcba   :  { %v3927_v1 = vpop.f32.mrb[33].mxu1 }
 0xcbb   :  { %v3461_v1 = vld [vmem:[%s4844_s4 + $0x18] sm:$0xff] }
 0xcbd   :  { %v2871_v0 = vpop.f32.mrb[34].mxu1 }
 0xcbe   :  { %3206 = vrot.lane.b32.xlu1 %v2871_v0, %s4258_s9  ;;  %v3937_v49 = vpop.f32.mrb[35].mxu1 }
 0xcbf   :  { %v3462_v49 = vld [vmem:[%s4844_s4 + $0x20] sm:$0xff] }
 0xcc1   :  { %v3036_v52 = vpop.f32.mrb[36].mxu1 }
 0xcc2   :  { %3210 = vrot.lane.b32.xlu1 %v3036_v52, %s4259_s10  ;;  %v3947_v53 = vpop.f32.mrb[37].mxu1  ;;  %v3463_v52 = vld [vmem:[%s4844_s4 + $0x28] sm:$0xff] }
 0xcc3   :  { %v4055_v53 = vpack.c.bf16 %v3463_v52, %v3462_v49 }
 0xcc5   :  { %v3201_v54 = vpop.f32.mrb[38].mxu1 }
 0xcc6   :  { %3214 = vrot.lane.b32.xlu0 %v3201_v54, %s4260_s11  ;;  %v3957_v55 = vpop.f32.mrb[39].mxu1  ;;  %3232 = vrot.lane.b32.xlu1 %v4584_v4, %s4257_s8  ;;  %v3464_v54 = vld [vmem:[%s4844_s4 + $0x30] sm:$0xff] }
 0xcc7   :  { %v3465_v55 = vld [vmem:[%s4844_s4 + $0x38] sm:$0xff] }
 0xcf3   :  { %v2534_v56 = vpop.permute.xlu1 %2533 }
 0xcf4   :  { %v2544_v58 = vsel %vm191_vm3, %v2033_v29, %v2534_v56  ;;  %v4059_v56 = vpack.c.bf16 %v3465_v55, %v3464_v54 }
 0xcf7   :  { %v2538_v57 = vpop.permute.xlu0 %2537 }
 0xcf8   :  { %v2545_v59 = vsel %vm861_vm5, %v2544_v58, %v2538_v57 }
 0xd28   :  { %v2542_v60 = vpop.permute.xlu0 %2541 }
 0xd29   :  { %v2546_v32 = vsel %vm863_vm6, %v2545_v59, %v2542_v60 }
 0xd2a   :  { %3966 = vmatprep.mubr.msk.f32.mxu0 %vm44_vm0, %v2546_v32 }
 0xd30   :  { %v3207_v61 = vpop.permute.xlu1 %3206 }
 0xd31   :  { %v3217_v63 = vsel %vm191_vm3, %v2706_v47, %v3207_v61  ;;  %v3460_v47 = vld [vmem:[%s4844_s4 + $0x10] sm:$0xff]  ;;  %s4261_s4 = smov [#allocation5]  }
 0xd32   :  { %v4051_v0 = vpack.c.bf16 %v3461_v1, %v3460_v47  ;;  %s3563_s19 = sshll.u32 %s4261_s4, 4  ;;  %s3564_s19 = int_to_ptr.vmem [resolvable:$true] %s3563_s19 }
 0xd33   :  { %s4216_s20 = scalar_lea.vmem %s3564_s19, 256  ;;  %p4221_p9 = scmp.lt.s32.totalorder %s3564_s19, %s3564_s19 }
 0xd34   :  { %v3211_v2 = vpop.permute.xlu1 %3210  ;;  %p4217_p8 = scmp.ne.s32.totalorder %s3564_s19, %s4216_s20  ;;  %p4222_p10 = scmp.lt.s32.totalorder %s4216_s20, %s4216_s20 }
 0xd35   :  { %v3218_v3 = vsel %vm861_vm5, %v3217_v63, %v3211_v2 }
 0xd36   :  { %p4223_p11 = por %p4222_p10, %p4221_p9 }
 0xd38   :  { %v3215_v5 = vpop.permute.xlu0 %3214  ;;  %v3233_v6 = vpop.permute.xlu1 %3232  ;;  %p4224_p12 = pnand %p4223_p11, %p4217_p8 }
 0xd39   :  { %v3219_v4 = vsel %vm863_vm6, %v3218_v3, %v3215_v5 }
 0xd3a   :  { %3967 = vmatmul.mubr.msk.f32.vlgmr.msra.gmra.mrb[32].mxu0 %vm44_vm0, %v3219_v4 }
 0xd3b   :  { %4050 = vmatpush3.bf16.msra.mxu0 %v4047_v46 }
 0xd3c   :  { %4052 = vmatprep.subr.bf16.mxu0 %v4051_v0 }
 0xd3f   :  { %4054 = vmatpush3.bf16.msra.mxu0 %v4051_v0 }
 0xd40   :  { %4056 = vmatprep.subr.bf16.mxu0 %v4055_v53 }
 0xd43   :  { %4058 = vmatpush3.bf16.msra.mxu0 %v4055_v53 }
 0xd44   :  { %4060 = vmatprep.subr.bf16.mxu0 %v4059_v56 }
 0xd47   :  { %4062 = vmatpush3.bf16.msra.mxu0 %v4059_v56 }
 0xe0d   :  { %v3968_v7 = vpop.f32.mrb[32].mxu0 }
 0xe0e   :  { %v3313_v8 = vadd.f32 %v3968_v7, %v3233_v6  ;;  %v3307_v9 = vpop.f32.mrb[33].mxu0 }
 0xe0f   :  { %v3308_v10 = vadd.f32 %v3307_v9, %v3233_v6 }
 0xe10   :  { %v4768_v15 = vadd.f32 %v3313_v8, %v4544_v42 }
 0xe11   :  { %v4771_v16 = vadd.f32 %v3308_v10, %v4547_v43  ;;  %v3641_v10 = vld [vmem:[#allocation2 + $0x4] ss:$0 sm:$0xff] }
 0xe12   :  { %v3322_v17 = vsel %vm44_vm0, %v4768_v15, 0.0 }
 0xe13   :  { %3323 = vadd.xlane.f32.xlu1 %v3322_v17  ;;  %v3319_v36 = vsel %vm44_vm0, %v4771_v16, 0.0 }
 0xe14   :  { %3320 = vadd.xlane.f32.xlu0 %v3319_v36 }
 0xe24   :  { %3362 = vrot.lane.b32.xlu1 %v3636_v19, %s4244_s21 }
 0xea0   :  { %v3324_v20 = vpop.xlane.xlu1 %3323 }
 0xea1   :  { %v3326_v11 = vmul.f32 0.03125, %v3324_v20  ;;  %v3321_v12 = vpop.xlane.xlu0 %3320 }
 0xea2   :  { %v3325_v13 = vmul.f32 0.03125, %v3321_v12 }
 0xea3   :  { %v3328_v42 = vsub.f32 %v4768_v15, %v3326_v11 }
 0xea4   :  { %v3327_v43 = vsub.f32 %v4771_v16, %v3325_v13  ;;  %v3363_v57 = vpop.permute.xlu1 %3362 }
 0xea5   :  { %v3330_v62 = vmul.f32 %v3328_v42, %v3328_v42 }
 0xea6   :  { %v3329_v50 = vmul.f32 %v3327_v43, %v3327_v43 }
 0xea7   :  { %v3334_v18 = vsel %vm44_vm0, %v3330_v62, 0.0 }
 0xea8   :  { %v3331_v14 = vsel %vm44_vm0, %v3329_v50, 0.0 }
 0xea9   :  { %3332 = vadd.xlane.f32.xlu0 %v3331_v14 }
 0xead   :  { %3335 = vadd.xlane.f32.xlu0 %v3334_v18 }
 0xec3   :  { %3353 = vrot.lane.b32.xlu0 %v3636_v19, %s4243_s5 }
 0xf36   :  { %v3333_v27 = vpop.xlane.xlu0 %3332 }
 0xf37   :  { %v3337_v28 = vmul.f32 0.03125, %v3333_v27 }
 0xf39   :  { %v3339_v29 = vadd.f32 1e-05, %v3337_v28 }
 0xf3a   :  { %v3336_v30 = vpop.xlane.xlu0 %3335 }
 0xf3b   :  { %4186 = vrsqrt.f32 %v3339_v29  ;;  %v3338_v31 = vmul.f32 0.03125, %v3336_v30 }
 0xf3d   :  { %v3340_v33 = vadd.f32 1e-05, %v3338_v31 }
 0xf3e   :  { %v3354_v37 = vpop.permute.xlu0 %3353 }
 0xf3f   :  { %4188 = vrsqrt.f32 %v3340_v33 }
 0xf45   :  { %v4187_v34 = vpop.eup %4186 }
 0xf46   :  { %v3343_v35 = vmul.f32 %v4187_v34, %v3327_v43 }
 0xf48   :  { %v3351_v51 = vmul.f32 %v3636_v19, %v3343_v35 }
 0xf49   :  { %v4189_v38 = vpop.eup %4188 }
 0xf4a   :  { %v3344_v39 = vmul.f32 %v4189_v38, %v3328_v42  ;;  %v3356_v44 = vadd.f32 %v3354_v37, %v3351_v51 }
 0xf4c   :  { %v3352_v40 = vmul.f32 %v3636_v19, %v3344_v39  ;;  %3977 = vmatprep.mubr.msk.f32.mxu1 %vm44_vm0, %v3356_v44 }
 0xf4e   :  { %v3357_v41 = vadd.f32 %v3354_v37, %v3352_v40 }
 0xf50   :  { %3978 = vmatmul.mubr.msk.f32.vlgmr.msra.gmra.mrb[40].mxu1 %vm44_vm0, %v3357_v41 }
0x1023   :  { %v3979_v58 = vpop.f32.mrb[40].mxu1 }
0x1024   :  { %v3443_v59 = vadd.f32 %v3979_v58, %v3363_v57  ;;  %v3437_v60 = vpop.f32.mrb[41].mxu1 }
0x1025   :  { %v3438_v32 = vadd.f32 %v3437_v60, %v3363_v57 }
0x1026   :  { %v3449_v61 = vmin.f32 %v3443_v59, 0.0  ;;  %vm3447_vm8 = vcmp.gt.f32.partialorder %v3443_v59, 0.0 }
0x1027   :  { %v3448_v2 = vmin.f32 %v3438_v32, 0.0  ;;  %vm3446_vm7 = vcmp.gt.f32.partialorder %v3438_v32, 0.0 }
0x1028   :  { %v3452_v63 = vmul.f32 1.442695, %v3449_v61 }
0x1029   :  { %v3450_v3 = vmul.f32 1.442695, %v3448_v2 }
0x102a   :  { %4190 = vpow2.f32 %v3452_v63 }
0x102b   :  { %4192 = vpow2.f32 %v3450_v3 }
0x1034   :  { %v4191_v5 = vpop.eup %4190 }
0x1035   :  { %v4193_v4 = vpop.eup %4192  ;;  %v3640_v6 = vadd.f32 -1.0, %v4191_v5 }
0x1036   :  { %v3639_v7 = vadd.f32 -1.0, %v4193_v4 }
0x1037   :  { %v3457_v9 = vsel %vm3447_vm8, %v3443_v59, %v3640_v6 }
0x1038   :  { %v3456_v8 = vsel %vm3446_vm7, %v3438_v32, %v3639_v7 }
0x1039   :  { %3996 = vmatprep.mubr.msk.f32.mxu0 %vm103_vm2, %v3456_v8 }
0x103a   :  { %3997 = vmatmul.mubr.msk.f32.vlgmr.msra.gmra.mrb[34].mxu0 %vm103_vm2, %v3457_v9 }
0x110d   :  { %v3998_v17 = vpop.f32.mrb[34].mxu0 }
0x110e   :  { %v3551_v36 = vadd.f32 %v3998_v17, %v3641_v10  ;;  %v3545_v19 = vpop.f32.mrb[35].mxu0 }
0x110f   :  { %v3546_v20 = vadd.f32 %v3641_v10, %v3545_v19 }
0x1110   :  { %v3555_v11 = vadd.f32 %v3551_v36, %v4768_v15 }
0x1111   :  { %v3554_v12 = vadd.f32 %v3546_v20, %v4771_v16 }
0x1112   :  { %3557 = vst.msk [vmem:[#allocation5 + $0x8] sm:$0xff] %vm44_vm0, %v3555_v11 }
0x1113   :  { %3556 = vst.msk [vmem:[#allocation5] sm:$0xff] %vm44_vm0, %v3554_v12 }
0x1114   :  { %4227 = shalt.err (!%p4224_p12)
}
0x1115   :  { %s4228_s1 = scalar_lea.hbm %s4846_s6, 256 }
0x1116   :  { %p4229_p13 = scmp.ne.s32.totalorder %s4846_s6, %s4228_s1  ;;  %p4232_p0 = scmp.lt.u32.totalorder %s4228_s1, %s4846_s6 }
0x1118   :  { %p4234_p1 = pnand %p4232_p0, %p4229_p13 }
0x111a   :  { %4237 = shalt.err (!%p4234_p1)
}
0x111b   :  { %s4262_s25 = smov 128  }
0x111c   :  { %3569 = dma.vmem_to_hbm [thread:$0]  %s3564_s19, 256, %s4846_s6, [#allocation4], %s4262_s25, %s4262_s25, %s4258_s9  }
0x111d   :  { %4240 = dma.done.wait [#allocation4], 256  }
0x111e   :  { %4241 = vsyncadd [#allocation4], 4294967040 }
0x111f   :  { %3573 = vsyncpa [#allocation3], 1 }
0x1120   :  { %3574 = vsyncpa [#allocation4], 1 }

</bundles_post_ra>
